<compile_context>
chip_gen: v5e
topology: v5e:2x2
jax: 0.10.0
libtpu: 0.0.40
codegen_flags: <defaults>
</compile_context>

<pallas_src>
import functools

import jax
import jax.numpy as jnp
from jax.experimental import pallas as pl
from jax.experimental.pallas import tpu as pltpu


def _gather_kernel(ids_ref, w_hbm, o_ref, buf, sems, *, window):
    """Gather one tile of embedding rows from the HBM table.

    ids_ref : SMEM int32 [N_pad]        scalar-prefetched token ids
    w_hbm   : HBM  [V, E]               embedding table (never fully resident in VMEM)
    o_ref   : VMEM [TM, E]              output tile
    buf     : VMEM [TM, E]              gather landing buffer
    sems    : DMA semaphore array [window]
    """
    tm, e = buf.shape
    v = w_hbm.shape[0]
    base = pl.program_id(0) * tm

    def issue(t):
        tok = ids_ref[base + t]
        # ignore_index=-1 fetches row 0 (zeroed after the wait); clamp keeps the DMA
        # in-bounds for any stray out-of-range id (PyTorch would raise instead).
        row = jnp.clip(tok, 0, v - 1)
        pltpu.make_async_copy(w_hbm.at[row], buf.at[t], sems.at[t % window]).start()

    def wait_and_mask(t):
        tok = ids_ref[base + t]            # scalar read BEFORE the wait (SMEM forwarding)
        pltpu.make_async_copy(w_hbm.at[0], buf.at[t], sems.at[t % window]).wait()

        @pl.when(tok < 0)
        def _():
            buf[t, :] = jnp.zeros((e,), buf.dtype)

    # Prime the DMA window, then steady-state: wait oldest row, issue the next one.
    for t in range(min(window, tm)):
        issue(t)
    for t in range(tm):
        wait_and_mask(t)
        if t + window < tm:
            issue(t + window)

    o_ref[...] = buf[...]


def _round_up(x, m):
    return (x + m - 1) // m * m


def row_parallel_embedding(x, weight, *, tokens_per_tile=256, dma_window=8):
    """x: int [batch, seq]; weight: [vocab, embed] -> [batch, seq, embed] (weight dtype)."""
    b, s = x.shape
    v, e = weight.shape
    n = b * s

    ids = x.reshape(n).astype(jnp.int32)

    # Token tile size: sublane-aligned, capped, and padded so the grid divides evenly.
    tm = min(tokens_per_tile, _round_up(n, 8))
    n_pad = _round_up(n, tm)
    if n_pad != n:
        ids = jnp.pad(ids, (0, n_pad - n))  # pad ids are 0 (valid row); sliced off below
    window = max(1, min(dma_window, tm))

    grid_spec = pltpu.PrefetchScalarGridSpec(
        num_scalar_prefetch=1,                         # ids -> SMEM
        grid=(n_pad // tm,),
        in_specs=[pl.BlockSpec(memory_space=pl.ANY)],  # weight stays in HBM
        out_specs=pl.BlockSpec((tm, e), lambda i, ids_ref: (i, 0)),
        scratch_shapes=[
            pltpu.VMEM((tm, e), weight.dtype),
            pltpu.SemaphoreType.DMA((window,)),
        ],
    )

    out = pl.pallas_call(
        functools.partial(_gather_kernel, window=window),
        out_shape=jax.ShapeDtypeStruct((n_pad, e), weight.dtype),
        grid_spec=grid_spec,
        compiler_params=pltpu.CompilerParams(
            dimension_semantics=("parallel",),         # token tiles split across TCs (v7x)
            vmem_limit_bytes=32 * 1024 * 1024,         # explicit; fits all generations
        ),
    )(ids, weight)

    return out[:n].reshape(b, s, e)


if __name__ == "__main__":
    key = jax.random.PRNGKey(0)
    k_w, k_x = jax.random.split(key)

    batch, seq = 2, 8
    vocab_size, embed_size = 32, 32

    # Deterministic parameter init (nn.Embedding(vocab_size, embed_size).weight analogue).
    weight = jax.random.normal(k_w, (vocab_size, embed_size), dtype=jnp.float32)
    # Token indices; include an ignore_index=-1 entry to exercise that path.
    x = jax.random.randint(k_x, (batch, seq), 0, vocab_size, dtype=jnp.int32)
    x = x.at[0, 0].set(-1)

    out = row_parallel_embedding(x, weight)
    out = jax.block_until_ready(out)

    # Pure-JAX reference: table lookup with -1 rows zeroed.
    valid = (x >= 0)
    ref = jnp.where(valid[..., None], weight[jnp.clip(x, 0, vocab_size - 1)], 0.0)
    assert out.shape == (batch, seq, embed_size)
    assert out.dtype == jnp.float32
    assert jnp.allclose(out, ref, atol=1e-5, rtol=1e-5)

    print("KERNEL_OK")
</pallas_src>

<mosaic_0001>
module attributes {stable_mosaic.version = 11 : i64} {
  func.func @_gather_kernel(%arg0: i32, %arg1: memref<16xi32, #tpu.memory_space<smem>>, %arg2: memref<32x32xf32, #tpu.memory_space<any>>, %arg3: memref<16x32xf32, #tpu.memory_space<vmem>>, %arg4: memref<16x32xf32, #tpu.memory_space<vmem>>, %arg5: memref<8x!tpu.dma_semaphore, #tpu.memory_space<semaphore_mem>>) attributes {dimension_semantics = [#tpu.dimension_semantics<parallel>], iteration_bounds = array<i64: 1>, scalar_prefetch = 1 : i64, scratch_operands = 2 : i64, tpu.core_type = #tpu.core_type<tc>, window_params = [{}, {transform_indices = @transform_1, window_bounds = array<i64: 16, 32>}]} {
    %c16_i32 = arith.constant 16 : i32
    %0 = arith.muli %arg0, %c16_i32 : i32
    %c0_i32 = arith.constant 0 : i32
    %1 = arith.addi %0, %c0_i32 : i32
    %2 = arith.index_cast %1 : i32 to index
    %3 = memref.load %arg1[%2] : memref<16xi32, #tpu.memory_space<smem>>
    %c0_i32_0 = arith.constant 0 : i32
    %c31_i32 = arith.constant 31 : i32
    %4 = arith.maxsi %c0_i32_0, %3 : i32
    %5 = arith.minsi %c31_i32, %4 : i32
    %c0_i32_1 = arith.constant 0 : i32
    %c0_i32_2 = arith.constant 0 : i32
    %c0_i32_3 = arith.constant 0 : i32
    %6 = tpu.memref_slice %arg2[%5, %c0_i32_3] : memref<32x32xf32, #tpu.memory_space<any>> -> memref<1x32xf32, #tpu.memory_space<any>>
    %7 = tpu.memref_squeeze %6 : memref<1x32xf32, #tpu.memory_space<any>> -> memref<32xf32, #tpu.memory_space<any>>
    %c0_i32_4 = arith.constant 0 : i32
    %8 = tpu.memref_slice %arg4[%c0_i32_1, %c0_i32_4] : memref<16x32xf32, #tpu.memory_space<vmem>> -> memref<1x32xf32, #tpu.memory_space<vmem>>
    %9 = tpu.memref_squeeze %8 : memref<1x32xf32, #tpu.memory_space<vmem>> -> memref<32xf32, #tpu.memory_space<vmem>>
    %10 = tpu.memref_slice %arg5[%c0_i32_2] : memref<8x!tpu.dma_semaphore, #tpu.memory_space<semaphore_mem>> -> memref<1x!tpu.dma_semaphore, #tpu.memory_space<semaphore_mem>>
    %11 = tpu.memref_squeeze %10 : memref<1x!tpu.dma_semaphore, #tpu.memory_space<semaphore_mem>> -> memref<!tpu.dma_semaphore, #tpu.memory_space<semaphore_mem>>
    tpu.enqueue_dma source(%7 : memref<32xf32, #tpu.memory_space<any>>) target(%9 : memref<32xf32, #tpu.memory_space<vmem>>) target_semaphore(%11 : memref<!tpu.dma_semaphore, #tpu.memory_space<semaphore_mem>>)
    %c1_i32 = arith.constant 1 : i32
    %12 = arith.addi %0, %c1_i32 : i32
    %13 = arith.index_cast %12 : i32 to index
    %14 = memref.load %arg1[%13] : memref<16xi32, #tpu.memory_space<smem>>
    %c0_i32_5 = arith.constant 0 : i32
    %c31_i32_6 = arith.constant 31 : i32
    %15 = arith.maxsi %c0_i32_5, %14 : i32
    %16 = arith.minsi %c31_i32_6, %15 : i32
    %c1_i32_7 = arith.constant 1 : i32
    %c1_i32_8 = arith.constant 1 : i32
    %c0_i32_9 = arith.constant 0 : i32
    %17 = tpu.memref_slice %arg2[%16, %c0_i32_9] : memref<32x32xf32, #tpu.memory_space<any>> -> memref<1x32xf32, #tpu.memory_space<any>>
    %18 = tpu.memref_squeeze %17 : memref<1x32xf32, #tpu.memory_space<any>> -> memref<32xf32, #tpu.memory_space<any>>
    %c0_i32_10 = arith.constant 0 : i32
    %19 = tpu.memref_slice %arg4[%c1_i32_7, %c0_i32_10] : memref<16x32xf32, #tpu.memory_space<vmem>> -> memref<1x32xf32, #tpu.memory_space<vmem>>
    %20 = tpu.memref_squeeze %19 : memref<1x32xf32, #tpu.memory_space<vmem>> -> memref<32xf32, #tpu.memory_space<vmem>>
    %21 = tpu.memref_slice %arg5[%c1_i32_8] : memref<8x!tpu.dma_semaphore, #tpu.memory_space<semaphore_mem>> -> memref<1x!tpu.dma_semaphore, #tpu.memory_space<semaphore_mem>>
    %22 = tpu.memref_squeeze %21 : memref<1x!tpu.dma_semaphore, #tpu.memory_space<semaphore_mem>> -> memref<!tpu.dma_semaphore, #tpu.memory_space<semaphore_mem>>
    tpu.enqueue_dma source(%18 : memref<32xf32, #tpu.memory_space<any>>) target(%20 : memref<32xf32, #tpu.memory_space<vmem>>) target_semaphore(%22 : memref<!tpu.dma_semaphore, #tpu.memory_space<semaphore_mem>>)
    %c2_i32 = arith.constant 2 : i32
    %23 = arith.addi %0, %c2_i32 : i32
    %24 = arith.index_cast %23 : i32 to index
    %25 = memref.load %arg1[%24] : memref<16xi32, #tpu.memory_space<smem>>
    %c0_i32_11 = arith.constant 0 : i32
    %c31_i32_12 = arith.constant 31 : i32
    %26 = arith.maxsi %c0_i32_11, %25 : i32
    %27 = arith.minsi %c31_i32_12, %26 : i32
    %c2_i32_13 = arith.constant 2 : i32
    %c2_i32_14 = arith.constant 2 : i32
    %c0_i32_15 = arith.constant 0 : i32
    %28 = tpu.memref_slice %arg2[%27, %c0_i32_15] : memref<32x32xf32, #tpu.memory_space<any>> -> memref<1x32xf32, #tpu.memory_space<any>>
    %29 = tpu.memref_squeeze %28 : memref<1x32xf32, #tpu.memory_space<any>> -> memref<32xf32, #tpu.memory_space<any>>
    %c0_i32_16 = arith.constant 0 : i32
    %30 = tpu.memref_slice %arg4[%c2_i32_13, %c0_i32_16] : memref<16x32xf32, #tpu.memory_space<vmem>> -> memref<1x32xf32, #tpu.memory_space<vmem>>
    %31 = tpu.memref_squeeze %30 : memref<1x32xf32, #tpu.memory_space<vmem>> -> memref<32xf32, #tpu.memory_space<vmem>>
    %32 = tpu.memref_slice %arg5[%c2_i32_14] : memref<8x!tpu.dma_semaphore, #tpu.memory_space<semaphore_mem>> -> memref<1x!tpu.dma_semaphore, #tpu.memory_space<semaphore_mem>>
    %33 = tpu.memref_squeeze %32 : memref<1x!tpu.dma_semaphore, #tpu.memory_space<semaphore_mem>> -> memref<!tpu.dma_semaphore, #tpu.memory_space<semaphore_mem>>
    tpu.enqueue_dma source(%29 : memref<32xf32, #tpu.memory_space<any>>) target(%31 : memref<32xf32, #tpu.memory_space<vmem>>) target_semaphore(%33 : memref<!tpu.dma_semaphore, #tpu.memory_space<semaphore_mem>>)
    %c3_i32 = arith.constant 3 : i32
    %34 = arith.addi %0, %c3_i32 : i32
    %35 = arith.index_cast %34 : i32 to index
    %36 = memref.load %arg1[%35] : memref<16xi32, #tpu.memory_space<smem>>
    %c0_i32_17 = arith.constant 0 : i32
    %c31_i32_18 = arith.constant 31 : i32
    %37 = arith.maxsi %c0_i32_17, %36 : i32
    %38 = arith.minsi %c31_i32_18, %37 : i32
    %c3_i32_19 = arith.constant 3 : i32
    %c3_i32_20 = arith.constant 3 : i32
    %c0_i32_21 = arith.constant 0 : i32
    %39 = tpu.memref_slice %arg2[%38, %c0_i32_21] : memref<32x32xf32, #tpu.memory_space<any>> -> memref<1x32xf32, #tpu.memory_space<any>>
    %40 = tpu.memref_squeeze %39 : memref<1x32xf32, #tpu.memory_space<any>> -> memref<32xf32, #tpu.memory_space<any>>
    %c0_i32_22 = arith.constant 0 : i32
    %41 = tpu.memref_slice %arg4[%c3_i32_19, %c0_i32_22] : memref<16x32xf32, #tpu.memory_space<vmem>> -> memref<1x32xf32, #tpu.memory_space<vmem>>
    %42 = tpu.memref_squeeze %41 : memref<1x32xf32, #tpu.memory_space<vmem>> -> memref<32xf32, #tpu.memory_space<vmem>>
    %43 = tpu.memref_slice %arg5[%c3_i32_20] : memref<8x!tpu.dma_semaphore, #tpu.memory_space<semaphore_mem>> -> memref<1x!tpu.dma_semaphore, #tpu.memory_space<semaphore_mem>>
    %44 = tpu.memref_squeeze %43 : memref<1x!tpu.dma_semaphore, #tpu.memory_space<semaphore_mem>> -> memref<!tpu.dma_semaphore, #tpu.memory_space<semaphore_mem>>
    tpu.enqueue_dma source(%40 : memref<32xf32, #tpu.memory_space<any>>) target(%42 : memref<32xf32, #tpu.memory_space<vmem>>) target_semaphore(%44 : memref<!tpu.dma_semaphore, #tpu.memory_space<semaphore_mem>>)
    %c4_i32 = arith.constant 4 : i32
    %45 = arith.addi %0, %c4_i32 : i32
    %46 = arith.index_cast %45 : i32 to index
    %47 = memref.load %arg1[%46] : memref<16xi32, #tpu.memory_space<smem>>
    %c0_i32_23 = arith.constant 0 : i32
    %c31_i32_24 = arith.constant 31 : i32
    %48 = arith.maxsi %c0_i32_23, %47 : i32
    %49 = arith.minsi %c31_i32_24, %48 : i32
    %c4_i32_25 = arith.constant 4 : i32
    %c4_i32_26 = arith.constant 4 : i32
    %c0_i32_27 = arith.constant 0 : i32
    %50 = tpu.memref_slice %arg2[%49, %c0_i32_27] : memref<32x32xf32, #tpu.memory_space<any>> -> memref<1x32xf32, #tpu.memory_space<any>>
    %51 = tpu.memref_squeeze %50 : memref<1x32xf32, #tpu.memory_space<any>> -> memref<32xf32, #tpu.memory_space<any>>
    %c0_i32_28 = arith.constant 0 : i32
    %52 = tpu.memref_slice %arg4[%c4_i32_25, %c0_i32_28] : memref<16x32xf32, #tpu.memory_space<vmem>> -> memref<1x32xf32, #tpu.memory_space<vmem>>
    %53 = tpu.memref_squeeze %52 : memref<1x32xf32, #tpu.memory_space<vmem>> -> memref<32xf32, #tpu.memory_space<vmem>>
    %54 = tpu.memref_slice %arg5[%c4_i32_26] : memref<8x!tpu.dma_semaphore, #tpu.memory_space<semaphore_mem>> -> memref<1x!tpu.dma_semaphore, #tpu.memory_space<semaphore_mem>>
    %55 = tpu.memref_squeeze %54 : memref<1x!tpu.dma_semaphore, #tpu.memory_space<semaphore_mem>> -> memref<!tpu.dma_semaphore, #tpu.memory_space<semaphore_mem>>
    tpu.enqueue_dma source(%51 : memref<32xf32, #tpu.memory_space<any>>) target(%53 : memref<32xf32, #tpu.memory_space<vmem>>) target_semaphore(%55 : memref<!tpu.dma_semaphore, #tpu.memory_space<semaphore_mem>>)
    %c5_i32 = arith.constant 5 : i32
    %56 = arith.addi %0, %c5_i32 : i32
    %57 = arith.index_cast %56 : i32 to index
    %58 = memref.load %arg1[%57] : memref<16xi32, #tpu.memory_space<smem>>
    %c0_i32_29 = arith.constant 0 : i32
    %c31_i32_30 = arith.constant 31 : i32
    %59 = arith.maxsi %c0_i32_29, %58 : i32
    %60 = arith.minsi %c31_i32_30, %59 : i32
    %c5_i32_31 = arith.constant 5 : i32
    %c5_i32_32 = arith.constant 5 : i32
    %c0_i32_33 = arith.constant 0 : i32
    %61 = tpu.memref_slice %arg2[%60, %c0_i32_33] : memref<32x32xf32, #tpu.memory_space<any>> -> memref<1x32xf32, #tpu.memory_space<any>>
    %62 = tpu.memref_squeeze %61 : memref<1x32xf32, #tpu.memory_space<any>> -> memref<32xf32, #tpu.memory_space<any>>
    %c0_i32_34 = arith.constant 0 : i32
    %63 = tpu.memref_slice %arg4[%c5_i32_31, %c0_i32_34] : memref<16x32xf32, #tpu.memory_space<vmem>> -> memref<1x32xf32, #tpu.memory_space<vmem>>
    %64 = tpu.memref_squeeze %63 : memref<1x32xf32, #tpu.memory_space<vmem>> -> memref<32xf32, #tpu.memory_space<vmem>>
    %65 = tpu.memref_slice %arg5[%c5_i32_32] : memref<8x!tpu.dma_semaphore, #tpu.memory_space<semaphore_mem>> -> memref<1x!tpu.dma_semaphore, #tpu.memory_space<semaphore_mem>>
    %66 = tpu.memref_squeeze %65 : memref<1x!tpu.dma_semaphore, #tpu.memory_space<semaphore_mem>> -> memref<!tpu.dma_semaphore, #tpu.memory_space<semaphore_mem>>
    tpu.enqueue_dma source(%62 : memref<32xf32, #tpu.memory_space<any>>) target(%64 : memref<32xf32, #tpu.memory_space<vmem>>) target_semaphore(%66 : memref<!tpu.dma_semaphore, #tpu.memory_space<semaphore_mem>>)
    %c6_i32 = arith.constant 6 : i32
    %67 = arith.addi %0, %c6_i32 : i32
    %68 = arith.index_cast %67 : i32 to index
    %69 = memref.load %arg1[%68] : memref<16xi32, #tpu.memory_space<smem>>
    %c0_i32_35 = arith.constant 0 : i32
    %c31_i32_36 = arith.constant 31 : i32
    %70 = arith.maxsi %c0_i32_35, %69 : i32
    %71 = arith.minsi %c31_i32_36, %70 : i32
    %c6_i32_37 = arith.constant 6 : i32
    %c6_i32_38 = arith.constant 6 : i32
    %c0_i32_39 = arith.constant 0 : i32
    %72 = tpu.memref_slice %arg2[%71, %c0_i32_39] : memref<32x32xf32, #tpu.memory_space<any>> -> memref<1x32xf32, #tpu.memory_space<any>>
    %73 = tpu.memref_squeeze %72 : memref<1x32xf32, #tpu.memory_space<any>> -> memref<32xf32, #tpu.memory_space<any>>
    %c0_i32_40 = arith.constant 0 : i32
    %74 = tpu.memref_slice %arg4[%c6_i32_37, %c0_i32_40] : memref<16x32xf32, #tpu.memory_space<vmem>> -> memref<1x32xf32, #tpu.memory_space<vmem>>
    %75 = tpu.memref_squeeze %74 : memref<1x32xf32, #tpu.memory_space<vmem>> -> memref<32xf32, #tpu.memory_space<vmem>>
    %76 = tpu.memref_slice %arg5[%c6_i32_38] : memref<8x!tpu.dma_semaphore, #tpu.memory_space<semaphore_mem>> -> memref<1x!tpu.dma_semaphore, #tpu.memory_space<semaphore_mem>>
    %77 = tpu.memref_squeeze %76 : memref<1x!tpu.dma_semaphore, #tpu.memory_space<semaphore_mem>> -> memref<!tpu.dma_semaphore, #tpu.memory_space<semaphore_mem>>
    tpu.enqueue_dma source(%73 : memref<32xf32, #tpu.memory_space<any>>) target(%75 : memref<32xf32, #tpu.memory_space<vmem>>) target_semaphore(%77 : memref<!tpu.dma_semaphore, #tpu.memory_space<semaphore_mem>>)
    %c7_i32 = arith.constant 7 : i32
    %78 = arith.addi %0, %c7_i32 : i32
    %79 = arith.index_cast %78 : i32 to index
    %80 = memref.load %arg1[%79] : memref<16xi32, #tpu.memory_space<smem>>
    %c0_i32_41 = arith.constant 0 : i32
    %c31_i32_42 = arith.constant 31 : i32
    %81 = arith.maxsi %c0_i32_41, %80 : i32
    %82 = arith.minsi %c31_i32_42, %81 : i32
    %c7_i32_43 = arith.constant 7 : i32
    %c7_i32_44 = arith.constant 7 : i32
    %c0_i32_45 = arith.constant 0 : i32
    %83 = tpu.memref_slice %arg2[%82, %c0_i32_45] : memref<32x32xf32, #tpu.memory_space<any>> -> memref<1x32xf32, #tpu.memory_space<any>>
    %84 = tpu.memref_squeeze %83 : memref<1x32xf32, #tpu.memory_space<any>> -> memref<32xf32, #tpu.memory_space<any>>
    %c0_i32_46 = arith.constant 0 : i32
    %85 = tpu.memref_slice %arg4[%c7_i32_43, %c0_i32_46] : memref<16x32xf32, #tpu.memory_space<vmem>> -> memref<1x32xf32, #tpu.memory_space<vmem>>
    %86 = tpu.memref_squeeze %85 : memref<1x32xf32, #tpu.memory_space<vmem>> -> memref<32xf32, #tpu.memory_space<vmem>>
    %87 = tpu.memref_slice %arg5[%c7_i32_44] : memref<8x!tpu.dma_semaphore, #tpu.memory_space<semaphore_mem>> -> memref<1x!tpu.dma_semaphore, #tpu.memory_space<semaphore_mem>>
    %88 = tpu.memref_squeeze %87 : memref<1x!tpu.dma_semaphore, #tpu.memory_space<semaphore_mem>> -> memref<!tpu.dma_semaphore, #tpu.memory_space<semaphore_mem>>
    tpu.enqueue_dma source(%84 : memref<32xf32, #tpu.memory_space<any>>) target(%86 : memref<32xf32, #tpu.memory_space<vmem>>) target_semaphore(%88 : memref<!tpu.dma_semaphore, #tpu.memory_space<semaphore_mem>>)
    %c0_i32_47 = arith.constant 0 : i32
    %89 = arith.addi %0, %c0_i32_47 : i32
    %90 = arith.index_cast %89 : i32 to index
    %91 = memref.load %arg1[%90] : memref<16xi32, #tpu.memory_space<smem>>
    %c0_i32_48 = arith.constant 0 : i32
    %c0_i32_49 = arith.constant 0 : i32
    %c0_i32_50 = arith.constant 0 : i32
    %c0_i32_51 = arith.constant 0 : i32
    %92 = tpu.memref_slice %arg2[%c0_i32_48, %c0_i32_51] : memref<32x32xf32, #tpu.memory_space<any>> -> memref<1x32xf32, #tpu.memory_space<any>>
    %93 = tpu.memref_squeeze %92 : memref<1x32xf32, #tpu.memory_space<any>> -> memref<32xf32, #tpu.memory_space<any>>
    %c0_i32_52 = arith.constant 0 : i32
    %94 = tpu.memref_slice %arg4[%c0_i32_49, %c0_i32_52] : memref<16x32xf32, #tpu.memory_space<vmem>> -> memref<1x32xf32, #tpu.memory_space<vmem>>
    %95 = tpu.memref_squeeze %94 : memref<1x32xf32, #tpu.memory_space<vmem>> -> memref<32xf32, #tpu.memory_space<vmem>>
    %96 = tpu.memref_slice %arg5[%c0_i32_50] : memref<8x!tpu.dma_semaphore, #tpu.memory_space<semaphore_mem>> -> memref<1x!tpu.dma_semaphore, #tpu.memory_space<semaphore_mem>>
    %97 = tpu.memref_squeeze %96 : memref<1x!tpu.dma_semaphore, #tpu.memory_space<semaphore_mem>> -> memref<!tpu.dma_semaphore, #tpu.memory_space<semaphore_mem>>
    tpu.wait_dma2 semaphore(%97 : memref<!tpu.dma_semaphore, #tpu.memory_space<semaphore_mem>>) src(%93 : memref<32xf32, #tpu.memory_space<any>>) dst(%95 : memref<32xf32, #tpu.memory_space<vmem>>)
    %c0_i32_53 = arith.constant 0 : i32
    %98 = arith.cmpi slt, %91, %c0_i32_53 : i32
    %99 = arith.extui %98 : i1 to i32
    %c0_i32_54 = arith.constant 0 : i32
    %100 = arith.cmpi ne, %99, %c0_i32_54 : i32
    scf.if %100 {
      %cst = arith.constant 0.000000e+00 : f32
      %371 = vector.broadcast %cst : f32 to vector<32xf32>
      %c0_226 = arith.constant 0 : index
      %c0_227 = arith.constant 0 : index
      %372 = vector.load %arg4[%c0_226, %c0_227] : memref<16x32xf32, #tpu.memory_space<vmem>>, vector<1x32xf32>
      %373 = vector.shape_cast %372 : vector<1x32xf32> to vector<32xf32>
      %374 = vector.shape_cast %371 : vector<32xf32> to vector<1x32xf32>
      tpu.vector_store %arg4[%c0_226, %c0_227], %374 {strides = array<i32>} : memref<16x32xf32, #tpu.memory_space<vmem>>, vector<1x32xf32>,
    } else {
    }
    %c8_i32 = arith.constant 8 : i32
    %101 = arith.addi %0, %c8_i32 : i32
    %102 = arith.index_cast %101 : i32 to index
    %103 = memref.load %arg1[%102] : memref<16xi32, #tpu.memory_space<smem>>
    %c0_i32_55 = arith.constant 0 : i32
    %c31_i32_56 = arith.constant 31 : i32
    %104 = arith.maxsi %c0_i32_55, %103 : i32
    %105 = arith.minsi %c31_i32_56, %104 : i32
    %c8_i32_57 = arith.constant 8 : i32
    %c0_i32_58 = arith.constant 0 : i32
    %c0_i32_59 = arith.constant 0 : i32
    %106 = tpu.memref_slice %arg2[%105, %c0_i32_59] : memref<32x32xf32, #tpu.memory_space<any>> -> memref<1x32xf32, #tpu.memory_space<any>>
    %107 = tpu.memref_squeeze %106 : memref<1x32xf32, #tpu.memory_space<any>> -> memref<32xf32, #tpu.memory_space<any>>
    %c0_i32_60 = arith.constant 0 : i32
    %108 = tpu.memref_slice %arg4[%c8_i32_57, %c0_i32_60] : memref<16x32xf32, #tpu.memory_space<vmem>> -> memref<1x32xf32, #tpu.memory_space<vmem>>
    %109 = tpu.memref_squeeze %108 : memref<1x32xf32, #tpu.memory_space<vmem>> -> memref<32xf32, #tpu.memory_space<vmem>>
    %110 = tpu.memref_slice %arg5[%c0_i32_58] : memref<8x!tpu.dma_semaphore, #tpu.memory_space<semaphore_mem>> -> memref<1x!tpu.dma_semaphore, #tpu.memory_space<semaphore_mem>>
    %111 = tpu.memref_squeeze %110 : memref<1x!tpu.dma_semaphore, #tpu.memory_space<semaphore_mem>> -> memref<!tpu.dma_semaphore, #tpu.memory_space<semaphore_mem>>
    tpu.enqueue_dma source(%107 : memref<32xf32, #tpu.memory_space<any>>) target(%109 : memref<32xf32, #tpu.memory_space<vmem>>) target_semaphore(%111 : memref<!tpu.dma_semaphore, #tpu.memory_space<semaphore_mem>>)
    %c1_i32_61 = arith.constant 1 : i32
    %112 = arith.addi %0, %c1_i32_61 : i32
    %113 = arith.index_cast %112 : i32 to index
    %114 = memref.load %arg1[%113] : memref<16xi32, #tpu.memory_space<smem>>
    %c0_i32_62 = arith.constant 0 : i32
    %c1_i32_63 = arith.constant 1 : i32
    %c1_i32_64 = arith.constant 1 : i32
    %c0_i32_65 = arith.constant 0 : i32
    %115 = tpu.memref_slice %arg2[%c0_i32_62, %c0_i32_65] : memref<32x32xf32, #tpu.memory_space<any>> -> memref<1x32xf32, #tpu.memory_space<any>>
    %116 = tpu.memref_squeeze %115 : memref<1x32xf32, #tpu.memory_space<any>> -> memref<32xf32, #tpu.memory_space<any>>
    %c0_i32_66 = arith.constant 0 : i32
    %117 = tpu.memref_slice %arg4[%c1_i32_63, %c0_i32_66] : memref<16x32xf32, #tpu.memory_space<vmem>> -> memref<1x32xf32, #tpu.memory_space<vmem>>
    %118 = tpu.memref_squeeze %117 : memref<1x32xf32, #tpu.memory_space<vmem>> -> memref<32xf32, #tpu.memory_space<vmem>>
    %119 = tpu.memref_slice %arg5[%c1_i32_64] : memref<8x!tpu.dma_semaphore, #tpu.memory_space<semaphore_mem>> -> memref<1x!tpu.dma_semaphore, #tpu.memory_space<semaphore_mem>>
    %120 = tpu.memref_squeeze %119 : memref<1x!tpu.dma_semaphore, #tpu.memory_space<semaphore_mem>> -> memref<!tpu.dma_semaphore, #tpu.memory_space<semaphore_mem>>
    tpu.wait_dma2 semaphore(%120 : memref<!tpu.dma_semaphore, #tpu.memory_space<semaphore_mem>>) src(%116 : memref<32xf32, #tpu.memory_space<any>>) dst(%118 : memref<32xf32, #tpu.memory_space<vmem>>)
    %c0_i32_67 = arith.constant 0 : i32
    %121 = arith.cmpi slt, %114, %c0_i32_67 : i32
    %122 = arith.extui %121 : i1 to i32
    %c0_i32_68 = arith.constant 0 : i32
    %123 = arith.cmpi ne, %122, %c0_i32_68 : i32
    scf.if %123 {
      %cst = arith.constant 0.000000e+00 : f32
      %371 = vector.broadcast %cst : f32 to vector<32xf32>
      %c1 = arith.constant 1 : index
      %c0_226 = arith.constant 0 : index
      %372 = vector.load %arg4[%c1, %c0_226] : memref<16x32xf32, #tpu.memory_space<vmem>>, vector<1x32xf32>
      %373 = vector.shape_cast %372 : vector<1x32xf32> to vector<32xf32>
      %374 = vector.shape_cast %371 : vector<32xf32> to vector<1x32xf32>
      tpu.vector_store %arg4[%c1, %c0_226], %374 {strides = array<i32>} : memref<16x32xf32, #tpu.memory_space<vmem>>, vector<1x32xf32>,
    } else {
    }
    %c9_i32 = arith.constant 9 : i32
    %124 = arith.addi %0, %c9_i32 : i32
    %125 = arith.index_cast %124 : i32 to index
    %126 = memref.load %arg1[%125] : memref<16xi32, #tpu.memory_space<smem>>
    %c0_i32_69 = arith.constant 0 : i32
    %c31_i32_70 = arith.constant 31 : i32
    %127 = arith.maxsi %c0_i32_69, %126 : i32
    %128 = arith.minsi %c31_i32_70, %127 : i32
    %c9_i32_71 = arith.constant 9 : i32
    %c1_i32_72 = arith.constant 1 : i32
    %c0_i32_73 = arith.constant 0 : i32
    %129 = tpu.memref_slice %arg2[%128, %c0_i32_73] : memref<32x32xf32, #tpu.memory_space<any>> -> memref<1x32xf32, #tpu.memory_space<any>>
    %130 = tpu.memref_squeeze %129 : memref<1x32xf32, #tpu.memory_space<any>> -> memref<32xf32, #tpu.memory_space<any>>
    %c0_i32_74 = arith.constant 0 : i32
    %131 = tpu.memref_slice %arg4[%c9_i32_71, %c0_i32_74] : memref<16x32xf32, #tpu.memory_space<vmem>> -> memref<1x32xf32, #tpu.memory_space<vmem>>
    %132 = tpu.memref_squeeze %131 : memref<1x32xf32, #tpu.memory_space<vmem>> -> memref<32xf32, #tpu.memory_space<vmem>>
    %133 = tpu.memref_slice %arg5[%c1_i32_72] : memref<8x!tpu.dma_semaphore, #tpu.memory_space<semaphore_mem>> -> memref<1x!tpu.dma_semaphore, #tpu.memory_space<semaphore_mem>>
    %134 = tpu.memref_squeeze %133 : memref<1x!tpu.dma_semaphore, #tpu.memory_space<semaphore_mem>> -> memref<!tpu.dma_semaphore, #tpu.memory_space<semaphore_mem>>
    tpu.enqueue_dma source(%130 : memref<32xf32, #tpu.memory_space<any>>) target(%132 : memref<32xf32, #tpu.memory_space<vmem>>) target_semaphore(%134 : memref<!tpu.dma_semaphore, #tpu.memory_space<semaphore_mem>>)
    %c2_i32_75 = arith.constant 2 : i32
    %135 = arith.addi %0, %c2_i32_75 : i32
    %136 = arith.index_cast %135 : i32 to index
    %137 = memref.load %arg1[%136] : memref<16xi32, #tpu.memory_space<smem>>
    %c0_i32_76 = arith.constant 0 : i32
    %c2_i32_77 = arith.constant 2 : i32
    %c2_i32_78 = arith.constant 2 : i32
    %c0_i32_79 = arith.constant 0 : i32
    %138 = tpu.memref_slice %arg2[%c0_i32_76, %c0_i32_79] : memref<32x32xf32, #tpu.memory_space<any>> -> memref<1x32xf32, #tpu.memory_space<any>>
    %139 = tpu.memref_squeeze %138 : memref<1x32xf32, #tpu.memory_space<any>> -> memref<32xf32, #tpu.memory_space<any>>
    %c0_i32_80 = arith.constant 0 : i32
    %140 = tpu.memref_slice %arg4[%c2_i32_77, %c0_i32_80] : memref<16x32xf32, #tpu.memory_space<vmem>> -> memref<1x32xf32, #tpu.memory_space<vmem>>
    %141 = tpu.memref_squeeze %140 : memref<1x32xf32, #tpu.memory_space<vmem>> -> memref<32xf32, #tpu.memory_space<vmem>>
    %142 = tpu.memref_slice %arg5[%c2_i32_78] : memref<8x!tpu.dma_semaphore, #tpu.memory_space<semaphore_mem>> -> memref<1x!tpu.dma_semaphore, #tpu.memory_space<semaphore_mem>>
    %143 = tpu.memref_squeeze %142 : memref<1x!tpu.dma_semaphore, #tpu.memory_space<semaphore_mem>> -> memref<!tpu.dma_semaphore, #tpu.memory_space<semaphore_mem>>
    tpu.wait_dma2 semaphore(%143 : memref<!tpu.dma_semaphore, #tpu.memory_space<semaphore_mem>>) src(%139 : memref<32xf32, #tpu.memory_space<any>>) dst(%141 : memref<32xf32, #tpu.memory_space<vmem>>)
    %c0_i32_81 = arith.constant 0 : i32
    %144 = arith.cmpi slt, %137, %c0_i32_81 : i32
    %145 = arith.extui %144 : i1 to i32
    %c0_i32_82 = arith.constant 0 : i32
    %146 = arith.cmpi ne, %145, %c0_i32_82 : i32
    scf.if %146 {
      %cst = arith.constant 0.000000e+00 : f32
      %371 = vector.broadcast %cst : f32 to vector<32xf32>
      %c2 = arith.constant 2 : index
      %c0_226 = arith.constant 0 : index
      %372 = vector.load %arg4[%c2, %c0_226] : memref<16x32xf32, #tpu.memory_space<vmem>>, vector<1x32xf32>
      %373 = vector.shape_cast %372 : vector<1x32xf32> to vector<32xf32>
      %374 = vector.shape_cast %371 : vector<32xf32> to vector<1x32xf32>
      tpu.vector_store %arg4[%c2, %c0_226], %374 {strides = array<i32>} : memref<16x32xf32, #tpu.memory_space<vmem>>, vector<1x32xf32>,
    } else {
    }
    %c10_i32 = arith.constant 10 : i32
    %147 = arith.addi %0, %c10_i32 : i32
    %148 = arith.index_cast %147 : i32 to index
    %149 = memref.load %arg1[%148] : memref<16xi32, #tpu.memory_space<smem>>
    %c0_i32_83 = arith.constant 0 : i32
    %c31_i32_84 = arith.constant 31 : i32
    %150 = arith.maxsi %c0_i32_83, %149 : i32
    %151 = arith.minsi %c31_i32_84, %150 : i32
    %c10_i32_85 = arith.constant 10 : i32
    %c2_i32_86 = arith.constant 2 : i32
    %c0_i32_87 = arith.constant 0 : i32
    %152 = tpu.memref_slice %arg2[%151, %c0_i32_87] : memref<32x32xf32, #tpu.memory_space<any>> -> memref<1x32xf32, #tpu.memory_space<any>>
    %153 = tpu.memref_squeeze %152 : memref<1x32xf32, #tpu.memory_space<any>> -> memref<32xf32, #tpu.memory_space<any>>
    %c0_i32_88 = arith.constant 0 : i32
    %154 = tpu.memref_slice %arg4[%c10_i32_85, %c0_i32_88] : memref<16x32xf32, #tpu.memory_space<vmem>> -> memref<1x32xf32, #tpu.memory_space<vmem>>
    %155 = tpu.memref_squeeze %154 : memref<1x32xf32, #tpu.memory_space<vmem>> -> memref<32xf32, #tpu.memory_space<vmem>>
    %156 = tpu.memref_slice %arg5[%c2_i32_86] : memref<8x!tpu.dma_semaphore, #tpu.memory_space<semaphore_mem>> -> memref<1x!tpu.dma_semaphore, #tpu.memory_space<semaphore_mem>>
    %157 = tpu.memref_squeeze %156 : memref<1x!tpu.dma_semaphore, #tpu.memory_space<semaphore_mem>> -> memref<!tpu.dma_semaphore, #tpu.memory_space<semaphore_mem>>
    tpu.enqueue_dma source(%153 : memref<32xf32, #tpu.memory_space<any>>) target(%155 : memref<32xf32, #tpu.memory_space<vmem>>) target_semaphore(%157 : memref<!tpu.dma_semaphore, #tpu.memory_space<semaphore_mem>>)
    %c3_i32_89 = arith.constant 3 : i32
    %158 = arith.addi %0, %c3_i32_89 : i32
    %159 = arith.index_cast %158 : i32 to index
    %160 = memref.load %arg1[%159] : memref<16xi32, #tpu.memory_space<smem>>
    %c0_i32_90 = arith.constant 0 : i32
    %c3_i32_91 = arith.constant 3 : i32
    %c3_i32_92 = arith.constant 3 : i32
    %c0_i32_93 = arith.constant 0 : i32
    %161 = tpu.memref_slice %arg2[%c0_i32_90, %c0_i32_93] : memref<32x32xf32, #tpu.memory_space<any>> -> memref<1x32xf32, #tpu.memory_space<any>>
    %162 = tpu.memref_squeeze %161 : memref<1x32xf32, #tpu.memory_space<any>> -> memref<32xf32, #tpu.memory_space<any>>
    %c0_i32_94 = arith.constant 0 : i32
    %163 = tpu.memref_slice %arg4[%c3_i32_91, %c0_i32_94] : memref<16x32xf32, #tpu.memory_space<vmem>> -> memref<1x32xf32, #tpu.memory_space<vmem>>
    %164 = tpu.memref_squeeze %163 : memref<1x32xf32, #tpu.memory_space<vmem>> -> memref<32xf32, #tpu.memory_space<vmem>>
    %165 = tpu.memref_slice %arg5[%c3_i32_92] : memref<8x!tpu.dma_semaphore, #tpu.memory_space<semaphore_mem>> -> memref<1x!tpu.dma_semaphore, #tpu.memory_space<semaphore_mem>>
    %166 = tpu.memref_squeeze %165 : memref<1x!tpu.dma_semaphore, #tpu.memory_space<semaphore_mem>> -> memref<!tpu.dma_semaphore, #tpu.memory_space<semaphore_mem>>
    tpu.wait_dma2 semaphore(%166 : memref<!tpu.dma_semaphore, #tpu.memory_space<semaphore_mem>>) src(%162 : memref<32xf32, #tpu.memory_space<any>>) dst(%164 : memref<32xf32, #tpu.memory_space<vmem>>)
    %c0_i32_95 = arith.constant 0 : i32
    %167 = arith.cmpi slt, %160, %c0_i32_95 : i32
    %168 = arith.extui %167 : i1 to i32
    %c0_i32_96 = arith.constant 0 : i32
    %169 = arith.cmpi ne, %168, %c0_i32_96 : i32
    scf.if %169 {
      %cst = arith.constant 0.000000e+00 : f32
      %371 = vector.broadcast %cst : f32 to vector<32xf32>
      %c3 = arith.constant 3 : index
      %c0_226 = arith.constant 0 : index
      %372 = vector.load %arg4[%c3, %c0_226] : memref<16x32xf32, #tpu.memory_space<vmem>>, vector<1x32xf32>
      %373 = vector.shape_cast %372 : vector<1x32xf32> to vector<32xf32>
      %374 = vector.shape_cast %371 : vector<32xf32> to vector<1x32xf32>
      tpu.vector_store %arg4[%c3, %c0_226], %374 {strides = array<i32>} : memref<16x32xf32, #tpu.memory_space<vmem>>, vector<1x32xf32>,
    } else {
    }
    %c11_i32 = arith.constant 11 : i32
    %170 = arith.addi %0, %c11_i32 : i32
    %171 = arith.index_cast %170 : i32 to index
    %172 = memref.load %arg1[%171] : memref<16xi32, #tpu.memory_space<smem>>
    %c0_i32_97 = arith.constant 0 : i32
    %c31_i32_98 = arith.constant 31 : i32
    %173 = arith.maxsi %c0_i32_97, %172 : i32
    %174 = arith.minsi %c31_i32_98, %173 : i32
    %c11_i32_99 = arith.constant 11 : i32
    %c3_i32_100 = arith.constant 3 : i32
    %c0_i32_101 = arith.constant 0 : i32
    %175 = tpu.memref_slice %arg2[%174, %c0_i32_101] : memref<32x32xf32, #tpu.memory_space<any>> -> memref<1x32xf32, #tpu.memory_space<any>>
    %176 = tpu.memref_squeeze %175 : memref<1x32xf32, #tpu.memory_space<any>> -> memref<32xf32, #tpu.memory_space<any>>
    %c0_i32_102 = arith.constant 0 : i32
    %177 = tpu.memref_slice %arg4[%c11_i32_99, %c0_i32_102] : memref<16x32xf32, #tpu.memory_space<vmem>> -> memref<1x32xf32, #tpu.memory_space<vmem>>
    %178 = tpu.memref_squeeze %177 : memref<1x32xf32, #tpu.memory_space<vmem>> -> memref<32xf32, #tpu.memory_space<vmem>>
    %179 = tpu.memref_slice %arg5[%c3_i32_100] : memref<8x!tpu.dma_semaphore, #tpu.memory_space<semaphore_mem>> -> memref<1x!tpu.dma_semaphore, #tpu.memory_space<semaphore_mem>>
    %180 = tpu.memref_squeeze %179 : memref<1x!tpu.dma_semaphore, #tpu.memory_space<semaphore_mem>> -> memref<!tpu.dma_semaphore, #tpu.memory_space<semaphore_mem>>
    tpu.enqueue_dma source(%176 : memref<32xf32, #tpu.memory_space<any>>) target(%178 : memref<32xf32, #tpu.memory_space<vmem>>) target_semaphore(%180 : memref<!tpu.dma_semaphore, #tpu.memory_space<semaphore_mem>>)
    %c4_i32_103 = arith.constant 4 : i32
    %181 = arith.addi %0, %c4_i32_103 : i32
    %182 = arith.index_cast %181 : i32 to index
    %183 = memref.load %arg1[%182] : memref<16xi32, #tpu.memory_space<smem>>
    %c0_i32_104 = arith.constant 0 : i32
    %c4_i32_105 = arith.constant 4 : i32
    %c4_i32_106 = arith.constant 4 : i32
    %c0_i32_107 = arith.constant 0 : i32
    %184 = tpu.memref_slice %arg2[%c0_i32_104, %c0_i32_107] : memref<32x32xf32, #tpu.memory_space<any>> -> memref<1x32xf32, #tpu.memory_space<any>>
    %185 = tpu.memref_squeeze %184 : memref<1x32xf32, #tpu.memory_space<any>> -> memref<32xf32, #tpu.memory_space<any>>
    %c0_i32_108 = arith.constant 0 : i32
    %186 = tpu.memref_slice %arg4[%c4_i32_105, %c0_i32_108] : memref<16x32xf32, #tpu.memory_space<vmem>> -> memref<1x32xf32, #tpu.memory_space<vmem>>
    %187 = tpu.memref_squeeze %186 : memref<1x32xf32, #tpu.memory_space<vmem>> -> memref<32xf32, #tpu.memory_space<vmem>>
    %188 = tpu.memref_slice %arg5[%c4_i32_106] : memref<8x!tpu.dma_semaphore, #tpu.memory_space<semaphore_mem>> -> memref<1x!tpu.dma_semaphore, #tpu.memory_space<semaphore_mem>>
    %189 = tpu.memref_squeeze %188 : memref<1x!tpu.dma_semaphore, #tpu.memory_space<semaphore_mem>> -> memref<!tpu.dma_semaphore, #tpu.memory_space<semaphore_mem>>
    tpu.wait_dma2 semaphore(%189 : memref<!tpu.dma_semaphore, #tpu.memory_space<semaphore_mem>>) src(%185 : memref<32xf32, #tpu.memory_space<any>>) dst(%187 : memref<32xf32, #tpu.memory_space<vmem>>)
    %c0_i32_109 = arith.constant 0 : i32
    %190 = arith.cmpi slt, %183, %c0_i32_109 : i32
    %191 = arith.extui %190 : i1 to i32
    %c0_i32_110 = arith.constant 0 : i32
    %192 = arith.cmpi ne, %191, %c0_i32_110 : i32
    scf.if %192 {
      %cst = arith.constant 0.000000e+00 : f32
      %371 = vector.broadcast %cst : f32 to vector<32xf32>
      %c4 = arith.constant 4 : index
      %c0_226 = arith.constant 0 : index
      %372 = vector.load %arg4[%c4, %c0_226] : memref<16x32xf32, #tpu.memory_space<vmem>>, vector<1x32xf32>
      %373 = vector.shape_cast %372 : vector<1x32xf32> to vector<32xf32>
      %374 = vector.shape_cast %371 : vector<32xf32> to vector<1x32xf32>
      tpu.vector_store %arg4[%c4, %c0_226], %374 {strides = array<i32>} : memref<16x32xf32, #tpu.memory_space<vmem>>, vector<1x32xf32>,
    } else {
    }
    %c12_i32 = arith.constant 12 : i32
    %193 = arith.addi %0, %c12_i32 : i32
    %194 = arith.index_cast %193 : i32 to index
    %195 = memref.load %arg1[%194] : memref<16xi32, #tpu.memory_space<smem>>
    %c0_i32_111 = arith.constant 0 : i32
    %c31_i32_112 = arith.constant 31 : i32
    %196 = arith.maxsi %c0_i32_111, %195 : i32
    %197 = arith.minsi %c31_i32_112, %196 : i32
    %c12_i32_113 = arith.constant 12 : i32
    %c4_i32_114 = arith.constant 4 : i32
    %c0_i32_115 = arith.constant 0 : i32
    %198 = tpu.memref_slice %arg2[%197, %c0_i32_115] : memref<32x32xf32, #tpu.memory_space<any>> -> memref<1x32xf32, #tpu.memory_space<any>>
    %199 = tpu.memref_squeeze %198 : memref<1x32xf32, #tpu.memory_space<any>> -> memref<32xf32, #tpu.memory_space<any>>
    %c0_i32_116 = arith.constant 0 : i32
    %200 = tpu.memref_slice %arg4[%c12_i32_113, %c0_i32_116] : memref<16x32xf32, #tpu.memory_space<vmem>> -> memref<1x32xf32, #tpu.memory_space<vmem>>
    %201 = tpu.memref_squeeze %200 : memref<1x32xf32, #tpu.memory_space<vmem>> -> memref<32xf32, #tpu.memory_space<vmem>>
    %202 = tpu.memref_slice %arg5[%c4_i32_114] : memref<8x!tpu.dma_semaphore, #tpu.memory_space<semaphore_mem>> -> memref<1x!tpu.dma_semaphore, #tpu.memory_space<semaphore_mem>>
    %203 = tpu.memref_squeeze %202 : memref<1x!tpu.dma_semaphore, #tpu.memory_space<semaphore_mem>> -> memref<!tpu.dma_semaphore, #tpu.memory_space<semaphore_mem>>
    tpu.enqueue_dma source(%199 : memref<32xf32, #tpu.memory_space<any>>) target(%201 : memref<32xf32, #tpu.memory_space<vmem>>) target_semaphore(%203 : memref<!tpu.dma_semaphore, #tpu.memory_space<semaphore_mem>>)
    %c5_i32_117 = arith.constant 5 : i32
    %204 = arith.addi %0, %c5_i32_117 : i32
    %205 = arith.index_cast %204 : i32 to index
    %206 = memref.load %arg1[%205] : memref<16xi32, #tpu.memory_space<smem>>
    %c0_i32_118 = arith.constant 0 : i32
    %c5_i32_119 = arith.constant 5 : i32
    %c5_i32_120 = arith.constant 5 : i32
    %c0_i32_121 = arith.constant 0 : i32
    %207 = tpu.memref_slice %arg2[%c0_i32_118, %c0_i32_121] : memref<32x32xf32, #tpu.memory_space<any>> -> memref<1x32xf32, #tpu.memory_space<any>>
    %208 = tpu.memref_squeeze %207 : memref<1x32xf32, #tpu.memory_space<any>> -> memref<32xf32, #tpu.memory_space<any>>
    %c0_i32_122 = arith.constant 0 : i32
    %209 = tpu.memref_slice %arg4[%c5_i32_119, %c0_i32_122] : memref<16x32xf32, #tpu.memory_space<vmem>> -> memref<1x32xf32, #tpu.memory_space<vmem>>
    %210 = tpu.memref_squeeze %209 : memref<1x32xf32, #tpu.memory_space<vmem>> -> memref<32xf32, #tpu.memory_space<vmem>>
    %211 = tpu.memref_slice %arg5[%c5_i32_120] : memref<8x!tpu.dma_semaphore, #tpu.memory_space<semaphore_mem>> -> memref<1x!tpu.dma_semaphore, #tpu.memory_space<semaphore_mem>>
    %212 = tpu.memref_squeeze %211 : memref<1x!tpu.dma_semaphore, #tpu.memory_space<semaphore_mem>> -> memref<!tpu.dma_semaphore, #tpu.memory_space<semaphore_mem>>
    tpu.wait_dma2 semaphore(%212 : memref<!tpu.dma_semaphore, #tpu.memory_space<semaphore_mem>>) src(%208 : memref<32xf32, #tpu.memory_space<any>>) dst(%210 : memref<32xf32, #tpu.memory_space<vmem>>)
    %c0_i32_123 = arith.constant 0 : i32
    %213 = arith.cmpi slt, %206, %c0_i32_123 : i32
    %214 = arith.extui %213 : i1 to i32
    %c0_i32_124 = arith.constant 0 : i32
    %215 = arith.cmpi ne, %214, %c0_i32_124 : i32
    scf.if %215 {
      %cst = arith.constant 0.000000e+00 : f32
      %371 = vector.broadcast %cst : f32 to vector<32xf32>
      %c5 = arith.constant 5 : index
      %c0_226 = arith.constant 0 : index
      %372 = vector.load %arg4[%c5, %c0_226] : memref<16x32xf32, #tpu.memory_space<vmem>>, vector<1x32xf32>
      %373 = vector.shape_cast %372 : vector<1x32xf32> to vector<32xf32>
      %374 = vector.shape_cast %371 : vector<32xf32> to vector<1x32xf32>
      tpu.vector_store %arg4[%c5, %c0_226], %374 {strides = array<i32>} : memref<16x32xf32, #tpu.memory_space<vmem>>, vector<1x32xf32>,
    } else {
    }
    %c13_i32 = arith.constant 13 : i32
    %216 = arith.addi %0, %c13_i32 : i32
    %217 = arith.index_cast %216 : i32 to index
    %218 = memref.load %arg1[%217] : memref<16xi32, #tpu.memory_space<smem>>
    %c0_i32_125 = arith.constant 0 : i32
    %c31_i32_126 = arith.constant 31 : i32
    %219 = arith.maxsi %c0_i32_125, %218 : i32
    %220 = arith.minsi %c31_i32_126, %219 : i32
    %c13_i32_127 = arith.constant 13 : i32
    %c5_i32_128 = arith.constant 5 : i32
    %c0_i32_129 = arith.constant 0 : i32
    %221 = tpu.memref_slice %arg2[%220, %c0_i32_129] : memref<32x32xf32, #tpu.memory_space<any>> -> memref<1x32xf32, #tpu.memory_space<any>>
    %222 = tpu.memref_squeeze %221 : memref<1x32xf32, #tpu.memory_space<any>> -> memref<32xf32, #tpu.memory_space<any>>
    %c0_i32_130 = arith.constant 0 : i32
    %223 = tpu.memref_slice %arg4[%c13_i32_127, %c0_i32_130] : memref<16x32xf32, #tpu.memory_space<vmem>> -> memref<1x32xf32, #tpu.memory_space<vmem>>
    %224 = tpu.memref_squeeze %223 : memref<1x32xf32, #tpu.memory_space<vmem>> -> memref<32xf32, #tpu.memory_space<vmem>>
    %225 = tpu.memref_slice %arg5[%c5_i32_128] : memref<8x!tpu.dma_semaphore, #tpu.memory_space<semaphore_mem>> -> memref<1x!tpu.dma_semaphore, #tpu.memory_space<semaphore_mem>>
    %226 = tpu.memref_squeeze %225 : memref<1x!tpu.dma_semaphore, #tpu.memory_space<semaphore_mem>> -> memref<!tpu.dma_semaphore, #tpu.memory_space<semaphore_mem>>
    tpu.enqueue_dma source(%222 : memref<32xf32, #tpu.memory_space<any>>) target(%224 : memref<32xf32, #tpu.memory_space<vmem>>) target_semaphore(%226 : memref<!tpu.dma_semaphore, #tpu.memory_space<semaphore_mem>>)
    %c6_i32_131 = arith.constant 6 : i32
    %227 = arith.addi %0, %c6_i32_131 : i32
    %228 = arith.index_cast %227 : i32 to index
    %229 = memref.load %arg1[%228] : memref<16xi32, #tpu.memory_space<smem>>
    %c0_i32_132 = arith.constant 0 : i32
    %c6_i32_133 = arith.constant 6 : i32
    %c6_i32_134 = arith.constant 6 : i32
    %c0_i32_135 = arith.constant 0 : i32
    %230 = tpu.memref_slice %arg2[%c0_i32_132, %c0_i32_135] : memref<32x32xf32, #tpu.memory_space<any>> -> memref<1x32xf32, #tpu.memory_space<any>>
    %231 = tpu.memref_squeeze %230 : memref<1x32xf32, #tpu.memory_space<any>> -> memref<32xf32, #tpu.memory_space<any>>
    %c0_i32_136 = arith.constant 0 : i32
    %232 = tpu.memref_slice %arg4[%c6_i32_133, %c0_i32_136] : memref<16x32xf32, #tpu.memory_space<vmem>> -> memref<1x32xf32, #tpu.memory_space<vmem>>
    %233 = tpu.memref_squeeze %232 : memref<1x32xf32, #tpu.memory_space<vmem>> -> memref<32xf32, #tpu.memory_space<vmem>>
    %234 = tpu.memref_slice %arg5[%c6_i32_134] : memref<8x!tpu.dma_semaphore, #tpu.memory_space<semaphore_mem>> -> memref<1x!tpu.dma_semaphore, #tpu.memory_space<semaphore_mem>>
    %235 = tpu.memref_squeeze %234 : memref<1x!tpu.dma_semaphore, #tpu.memory_space<semaphore_mem>> -> memref<!tpu.dma_semaphore, #tpu.memory_space<semaphore_mem>>
    tpu.wait_dma2 semaphore(%235 : memref<!tpu.dma_semaphore, #tpu.memory_space<semaphore_mem>>) src(%231 : memref<32xf32, #tpu.memory_space<any>>) dst(%233 : memref<32xf32, #tpu.memory_space<vmem>>)
    %c0_i32_137 = arith.constant 0 : i32
    %236 = arith.cmpi slt, %229, %c0_i32_137 : i32
    %237 = arith.extui %236 : i1 to i32
    %c0_i32_138 = arith.constant 0 : i32
    %238 = arith.cmpi ne, %237, %c0_i32_138 : i32
    scf.if %238 {
      %cst = arith.constant 0.000000e+00 : f32
      %371 = vector.broadcast %cst : f32 to vector<32xf32>
      %c6 = arith.constant 6 : index
      %c0_226 = arith.constant 0 : index
      %372 = vector.load %arg4[%c6, %c0_226] : memref<16x32xf32, #tpu.memory_space<vmem>>, vector<1x32xf32>
      %373 = vector.shape_cast %372 : vector<1x32xf32> to vector<32xf32>
      %374 = vector.shape_cast %371 : vector<32xf32> to vector<1x32xf32>
      tpu.vector_store %arg4[%c6, %c0_226], %374 {strides = array<i32>} : memref<16x32xf32, #tpu.memory_space<vmem>>, vector<1x32xf32>,
    } else {
    }
    %c14_i32 = arith.constant 14 : i32
    %239 = arith.addi %0, %c14_i32 : i32
    %240 = arith.index_cast %239 : i32 to index
    %241 = memref.load %arg1[%240] : memref<16xi32, #tpu.memory_space<smem>>
    %c0_i32_139 = arith.constant 0 : i32
    %c31_i32_140 = arith.constant 31 : i32
    %242 = arith.maxsi %c0_i32_139, %241 : i32
    %243 = arith.minsi %c31_i32_140, %242 : i32
    %c14_i32_141 = arith.constant 14 : i32
    %c6_i32_142 = arith.constant 6 : i32
    %c0_i32_143 = arith.constant 0 : i32
    %244 = tpu.memref_slice %arg2[%243, %c0_i32_143] : memref<32x32xf32, #tpu.memory_space<any>> -> memref<1x32xf32, #tpu.memory_space<any>>
    %245 = tpu.memref_squeeze %244 : memref<1x32xf32, #tpu.memory_space<any>> -> memref<32xf32, #tpu.memory_space<any>>
    %c0_i32_144 = arith.constant 0 : i32
    %246 = tpu.memref_slice %arg4[%c14_i32_141, %c0_i32_144] : memref<16x32xf32, #tpu.memory_space<vmem>> -> memref<1x32xf32, #tpu.memory_space<vmem>>
    %247 = tpu.memref_squeeze %246 : memref<1x32xf32, #tpu.memory_space<vmem>> -> memref<32xf32, #tpu.memory_space<vmem>>
    %248 = tpu.memref_slice %arg5[%c6_i32_142] : memref<8x!tpu.dma_semaphore, #tpu.memory_space<semaphore_mem>> -> memref<1x!tpu.dma_semaphore, #tpu.memory_space<semaphore_mem>>
    %249 = tpu.memref_squeeze %248 : memref<1x!tpu.dma_semaphore, #tpu.memory_space<semaphore_mem>> -> memref<!tpu.dma_semaphore, #tpu.memory_space<semaphore_mem>>
    tpu.enqueue_dma source(%245 : memref<32xf32, #tpu.memory_space<any>>) target(%247 : memref<32xf32, #tpu.memory_space<vmem>>) target_semaphore(%249 : memref<!tpu.dma_semaphore, #tpu.memory_space<semaphore_mem>>)
    %c7_i32_145 = arith.constant 7 : i32
    %250 = arith.addi %0, %c7_i32_145 : i32
    %251 = arith.index_cast %250 : i32 to index
    %252 = memref.load %arg1[%251] : memref<16xi32, #tpu.memory_space<smem>>
    %c0_i32_146 = arith.constant 0 : i32
    %c7_i32_147 = arith.constant 7 : i32
    %c7_i32_148 = arith.constant 7 : i32
    %c0_i32_149 = arith.constant 0 : i32
    %253 = tpu.memref_slice %arg2[%c0_i32_146, %c0_i32_149] : memref<32x32xf32, #tpu.memory_space<any>> -> memref<1x32xf32, #tpu.memory_space<any>>
    %254 = tpu.memref_squeeze %253 : memref<1x32xf32, #tpu.memory_space<any>> -> memref<32xf32, #tpu.memory_space<any>>
    %c0_i32_150 = arith.constant 0 : i32
    %255 = tpu.memref_slice %arg4[%c7_i32_147, %c0_i32_150] : memref<16x32xf32, #tpu.memory_space<vmem>> -> memref<1x32xf32, #tpu.memory_space<vmem>>
    %256 = tpu.memref_squeeze %255 : memref<1x32xf32, #tpu.memory_space<vmem>> -> memref<32xf32, #tpu.memory_space<vmem>>
    %257 = tpu.memref_slice %arg5[%c7_i32_148] : memref<8x!tpu.dma_semaphore, #tpu.memory_space<semaphore_mem>> -> memref<1x!tpu.dma_semaphore, #tpu.memory_space<semaphore_mem>>
    %258 = tpu.memref_squeeze %257 : memref<1x!tpu.dma_semaphore, #tpu.memory_space<semaphore_mem>> -> memref<!tpu.dma_semaphore, #tpu.memory_space<semaphore_mem>>
    tpu.wait_dma2 semaphore(%258 : memref<!tpu.dma_semaphore, #tpu.memory_space<semaphore_mem>>) src(%254 : memref<32xf32, #tpu.memory_space<any>>) dst(%256 : memref<32xf32, #tpu.memory_space<vmem>>)
    %c0_i32_151 = arith.constant 0 : i32
    %259 = arith.cmpi slt, %252, %c0_i32_151 : i32
    %260 = arith.extui %259 : i1 to i32
    %c0_i32_152 = arith.constant 0 : i32
    %261 = arith.cmpi ne, %260, %c0_i32_152 : i32
    scf.if %261 {
      %cst = arith.constant 0.000000e+00 : f32
      %371 = vector.broadcast %cst : f32 to vector<32xf32>
      %c7 = arith.constant 7 : index
      %c0_226 = arith.constant 0 : index
      %372 = vector.load %arg4[%c7, %c0_226] : memref<16x32xf32, #tpu.memory_space<vmem>>, vector<1x32xf32>
      %373 = vector.shape_cast %372 : vector<1x32xf32> to vector<32xf32>
      %374 = vector.shape_cast %371 : vector<32xf32> to vector<1x32xf32>
      tpu.vector_store %arg4[%c7, %c0_226], %374 {strides = array<i32>} : memref<16x32xf32, #tpu.memory_space<vmem>>, vector<1x32xf32>,
    } else {
    }
    %c15_i32 = arith.constant 15 : i32
    %262 = arith.addi %0, %c15_i32 : i32
    %263 = arith.index_cast %262 : i32 to index
    %264 = memref.load %arg1[%263] : memref<16xi32, #tpu.memory_space<smem>>
    %c0_i32_153 = arith.constant 0 : i32
    %c31_i32_154 = arith.constant 31 : i32
    %265 = arith.maxsi %c0_i32_153, %264 : i32
    %266 = arith.minsi %c31_i32_154, %265 : i32
    %c15_i32_155 = arith.constant 15 : i32
    %c7_i32_156 = arith.constant 7 : i32
    %c0_i32_157 = arith.constant 0 : i32
    %267 = tpu.memref_slice %arg2[%266, %c0_i32_157] : memref<32x32xf32, #tpu.memory_space<any>> -> memref<1x32xf32, #tpu.memory_space<any>>
    %268 = tpu.memref_squeeze %267 : memref<1x32xf32, #tpu.memory_space<any>> -> memref<32xf32, #tpu.memory_space<any>>
    %c0_i32_158 = arith.constant 0 : i32
    %269 = tpu.memref_slice %arg4[%c15_i32_155, %c0_i32_158] : memref<16x32xf32, #tpu.memory_space<vmem>> -> memref<1x32xf32, #tpu.memory_space<vmem>>
    %270 = tpu.memref_squeeze %269 : memref<1x32xf32, #tpu.memory_space<vmem>> -> memref<32xf32, #tpu.memory_space<vmem>>
    %271 = tpu.memref_slice %arg5[%c7_i32_156] : memref<8x!tpu.dma_semaphore, #tpu.memory_space<semaphore_mem>> -> memref<1x!tpu.dma_semaphore, #tpu.memory_space<semaphore_mem>>
    %272 = tpu.memref_squeeze %271 : memref<1x!tpu.dma_semaphore, #tpu.memory_space<semaphore_mem>> -> memref<!tpu.dma_semaphore, #tpu.memory_space<semaphore_mem>>
    tpu.enqueue_dma source(%268 : memref<32xf32, #tpu.memory_space<any>>) target(%270 : memref<32xf32, #tpu.memory_space<vmem>>) target_semaphore(%272 : memref<!tpu.dma_semaphore, #tpu.memory_space<semaphore_mem>>)
    %c8_i32_159 = arith.constant 8 : i32
    %273 = arith.addi %0, %c8_i32_159 : i32
    %274 = arith.index_cast %273 : i32 to index
    %275 = memref.load %arg1[%274] : memref<16xi32, #tpu.memory_space<smem>>
    %c0_i32_160 = arith.constant 0 : i32
    %c8_i32_161 = arith.constant 8 : i32
    %c0_i32_162 = arith.constant 0 : i32
    %c0_i32_163 = arith.constant 0 : i32
    %276 = tpu.memref_slice %arg2[%c0_i32_160, %c0_i32_163] : memref<32x32xf32, #tpu.memory_space<any>> -> memref<1x32xf32, #tpu.memory_space<any>>
    %277 = tpu.memref_squeeze %276 : memref<1x32xf32, #tpu.memory_space<any>> -> memref<32xf32, #tpu.memory_space<any>>
    %c0_i32_164 = arith.constant 0 : i32
    %278 = tpu.memref_slice %arg4[%c8_i32_161, %c0_i32_164] : memref<16x32xf32, #tpu.memory_space<vmem>> -> memref<1x32xf32, #tpu.memory_space<vmem>>
    %279 = tpu.memref_squeeze %278 : memref<1x32xf32, #tpu.memory_space<vmem>> -> memref<32xf32, #tpu.memory_space<vmem>>
    %280 = tpu.memref_slice %arg5[%c0_i32_162] : memref<8x!tpu.dma_semaphore, #tpu.memory_space<semaphore_mem>> -> memref<1x!tpu.dma_semaphore, #tpu.memory_space<semaphore_mem>>
    %281 = tpu.memref_squeeze %280 : memref<1x!tpu.dma_semaphore, #tpu.memory_space<semaphore_mem>> -> memref<!tpu.dma_semaphore, #tpu.memory_space<semaphore_mem>>
    tpu.wait_dma2 semaphore(%281 : memref<!tpu.dma_semaphore, #tpu.memory_space<semaphore_mem>>) src(%277 : memref<32xf32, #tpu.memory_space<any>>) dst(%279 : memref<32xf32, #tpu.memory_space<vmem>>)
    %c0_i32_165 = arith.constant 0 : i32
    %282 = arith.cmpi slt, %275, %c0_i32_165 : i32
    %283 = arith.extui %282 : i1 to i32
    %c0_i32_166 = arith.constant 0 : i32
    %284 = arith.cmpi ne, %283, %c0_i32_166 : i32
    scf.if %284 {
      %cst = arith.constant 0.000000e+00 : f32
      %371 = vector.broadcast %cst : f32 to vector<32xf32>
      %c8 = arith.constant 8 : index
      %c0_226 = arith.constant 0 : index
      %372 = vector.load %arg4[%c8, %c0_226] : memref<16x32xf32, #tpu.memory_space<vmem>>, vector<1x32xf32>
      %373 = vector.shape_cast %372 : vector<1x32xf32> to vector<32xf32>
      %374 = vector.shape_cast %371 : vector<32xf32> to vector<1x32xf32>
      tpu.vector_store %arg4[%c8, %c0_226], %374 {strides = array<i32>} : memref<16x32xf32, #tpu.memory_space<vmem>>, vector<1x32xf32>,
    } else {
    }
    %c9_i32_167 = arith.constant 9 : i32
    %285 = arith.addi %0, %c9_i32_167 : i32
    %286 = arith.index_cast %285 : i32 to index
    %287 = memref.load %arg1[%286] : memref<16xi32, #tpu.memory_space<smem>>
    %c0_i32_168 = arith.constant 0 : i32
    %c9_i32_169 = arith.constant 9 : i32
    %c1_i32_170 = arith.constant 1 : i32
    %c0_i32_171 = arith.constant 0 : i32
    %288 = tpu.memref_slice %arg2[%c0_i32_168, %c0_i32_171] : memref<32x32xf32, #tpu.memory_space<any>> -> memref<1x32xf32, #tpu.memory_space<any>>
    %289 = tpu.memref_squeeze %288 : memref<1x32xf32, #tpu.memory_space<any>> -> memref<32xf32, #tpu.memory_space<any>>
    %c0_i32_172 = arith.constant 0 : i32
    %290 = tpu.memref_slice %arg4[%c9_i32_169, %c0_i32_172] : memref<16x32xf32, #tpu.memory_space<vmem>> -> memref<1x32xf32, #tpu.memory_space<vmem>>
    %291 = tpu.memref_squeeze %290 : memref<1x32xf32, #tpu.memory_space<vmem>> -> memref<32xf32, #tpu.memory_space<vmem>>
    %292 = tpu.memref_slice %arg5[%c1_i32_170] : memref<8x!tpu.dma_semaphore, #tpu.memory_space<semaphore_mem>> -> memref<1x!tpu.dma_semaphore, #tpu.memory_space<semaphore_mem>>
    %293 = tpu.memref_squeeze %292 : memref<1x!tpu.dma_semaphore, #tpu.memory_space<semaphore_mem>> -> memref<!tpu.dma_semaphore, #tpu.memory_space<semaphore_mem>>
    tpu.wait_dma2 semaphore(%293 : memref<!tpu.dma_semaphore, #tpu.memory_space<semaphore_mem>>) src(%289 : memref<32xf32, #tpu.memory_space<any>>) dst(%291 : memref<32xf32, #tpu.memory_space<vmem>>)
    %c0_i32_173 = arith.constant 0 : i32
    %294 = arith.cmpi slt, %287, %c0_i32_173 : i32
    %295 = arith.extui %294 : i1 to i32
    %c0_i32_174 = arith.constant 0 : i32
    %296 = arith.cmpi ne, %295, %c0_i32_174 : i32
    scf.if %296 {
      %cst = arith.constant 0.000000e+00 : f32
      %371 = vector.broadcast %cst : f32 to vector<32xf32>
      %c9 = arith.constant 9 : index
      %c0_226 = arith.constant 0 : index
      %372 = vector.load %arg4[%c9, %c0_226] : memref<16x32xf32, #tpu.memory_space<vmem>>, vector<1x32xf32>
      %373 = vector.shape_cast %372 : vector<1x32xf32> to vector<32xf32>
      %374 = vector.shape_cast %371 : vector<32xf32> to vector<1x32xf32>
      tpu.vector_store %arg4[%c9, %c0_226], %374 {strides = array<i32>} : memref<16x32xf32, #tpu.memory_space<vmem>>, vector<1x32xf32>,
    } else {
    }
    %c10_i32_175 = arith.constant 10 : i32
    %297 = arith.addi %0, %c10_i32_175 : i32
    %298 = arith.index_cast %297 : i32 to index
    %299 = memref.load %arg1[%298] : memref<16xi32, #tpu.memory_space<smem>>
    %c0_i32_176 = arith.constant 0 : i32
    %c10_i32_177 = arith.constant 10 : i32
    %c2_i32_178 = arith.constant 2 : i32
    %c0_i32_179 = arith.constant 0 : i32
    %300 = tpu.memref_slice %arg2[%c0_i32_176, %c0_i32_179] : memref<32x32xf32, #tpu.memory_space<any>> -> memref<1x32xf32, #tpu.memory_space<any>>
    %301 = tpu.memref_squeeze %300 : memref<1x32xf32, #tpu.memory_space<any>> -> memref<32xf32, #tpu.memory_space<any>>
    %c0_i32_180 = arith.constant 0 : i32
    %302 = tpu.memref_slice %arg4[%c10_i32_177, %c0_i32_180] : memref<16x32xf32, #tpu.memory_space<vmem>> -> memref<1x32xf32, #tpu.memory_space<vmem>>
    %303 = tpu.memref_squeeze %302 : memref<1x32xf32, #tpu.memory_space<vmem>> -> memref<32xf32, #tpu.memory_space<vmem>>
    %304 = tpu.memref_slice %arg5[%c2_i32_178] : memref<8x!tpu.dma_semaphore, #tpu.memory_space<semaphore_mem>> -> memref<1x!tpu.dma_semaphore, #tpu.memory_space<semaphore_mem>>
    %305 = tpu.memref_squeeze %304 : memref<1x!tpu.dma_semaphore, #tpu.memory_space<semaphore_mem>> -> memref<!tpu.dma_semaphore, #tpu.memory_space<semaphore_mem>>
    tpu.wait_dma2 semaphore(%305 : memref<!tpu.dma_semaphore, #tpu.memory_space<semaphore_mem>>) src(%301 : memref<32xf32, #tpu.memory_space<any>>) dst(%303 : memref<32xf32, #tpu.memory_space<vmem>>)
    %c0_i32_181 = arith.constant 0 : i32
    %306 = arith.cmpi slt, %299, %c0_i32_181 : i32
    %307 = arith.extui %306 : i1 to i32
    %c0_i32_182 = arith.constant 0 : i32
    %308 = arith.cmpi ne, %307, %c0_i32_182 : i32
    scf.if %308 {
      %cst = arith.constant 0.000000e+00 : f32
      %371 = vector.broadcast %cst : f32 to vector<32xf32>
      %c10 = arith.constant 10 : index
      %c0_226 = arith.constant 0 : index
      %372 = vector.load %arg4[%c10, %c0_226] : memref<16x32xf32, #tpu.memory_space<vmem>>, vector<1x32xf32>
      %373 = vector.shape_cast %372 : vector<1x32xf32> to vector<32xf32>
      %374 = vector.shape_cast %371 : vector<32xf32> to vector<1x32xf32>
      tpu.vector_store %arg4[%c10, %c0_226], %374 {strides = array<i32>} : memref<16x32xf32, #tpu.memory_space<vmem>>, vector<1x32xf32>,
    } else {
    }
    %c11_i32_183 = arith.constant 11 : i32
    %309 = arith.addi %0, %c11_i32_183 : i32
    %310 = arith.index_cast %309 : i32 to index
    %311 = memref.load %arg1[%310] : memref<16xi32, #tpu.memory_space<smem>>
    %c0_i32_184 = arith.constant 0 : i32
    %c11_i32_185 = arith.constant 11 : i32
    %c3_i32_186 = arith.constant 3 : i32
    %c0_i32_187 = arith.constant 0 : i32
    %312 = tpu.memref_slice %arg2[%c0_i32_184, %c0_i32_187] : memref<32x32xf32, #tpu.memory_space<any>> -> memref<1x32xf32, #tpu.memory_space<any>>
    %313 = tpu.memref_squeeze %312 : memref<1x32xf32, #tpu.memory_space<any>> -> memref<32xf32, #tpu.memory_space<any>>
    %c0_i32_188 = arith.constant 0 : i32
    %314 = tpu.memref_slice %arg4[%c11_i32_185, %c0_i32_188] : memref<16x32xf32, #tpu.memory_space<vmem>> -> memref<1x32xf32, #tpu.memory_space<vmem>>
    %315 = tpu.memref_squeeze %314 : memref<1x32xf32, #tpu.memory_space<vmem>> -> memref<32xf32, #tpu.memory_space<vmem>>
    %316 = tpu.memref_slice %arg5[%c3_i32_186] : memref<8x!tpu.dma_semaphore, #tpu.memory_space<semaphore_mem>> -> memref<1x!tpu.dma_semaphore, #tpu.memory_space<semaphore_mem>>
    %317 = tpu.memref_squeeze %316 : memref<1x!tpu.dma_semaphore, #tpu.memory_space<semaphore_mem>> -> memref<!tpu.dma_semaphore, #tpu.memory_space<semaphore_mem>>
    tpu.wait_dma2 semaphore(%317 : memref<!tpu.dma_semaphore, #tpu.memory_space<semaphore_mem>>) src(%313 : memref<32xf32, #tpu.memory_space<any>>) dst(%315 : memref<32xf32, #tpu.memory_space<vmem>>)
    %c0_i32_189 = arith.constant 0 : i32
    %318 = arith.cmpi slt, %311, %c0_i32_189 : i32
    %319 = arith.extui %318 : i1 to i32
    %c0_i32_190 = arith.constant 0 : i32
    %320 = arith.cmpi ne, %319, %c0_i32_190 : i32
    scf.if %320 {
      %cst = arith.constant 0.000000e+00 : f32
      %371 = vector.broadcast %cst : f32 to vector<32xf32>
      %c11 = arith.constant 11 : index
      %c0_226 = arith.constant 0 : index
      %372 = vector.load %arg4[%c11, %c0_226] : memref<16x32xf32, #tpu.memory_space<vmem>>, vector<1x32xf32>
      %373 = vector.shape_cast %372 : vector<1x32xf32> to vector<32xf32>
      %374 = vector.shape_cast %371 : vector<32xf32> to vector<1x32xf32>
      tpu.vector_store %arg4[%c11, %c0_226], %374 {strides = array<i32>} : memref<16x32xf32, #tpu.memory_space<vmem>>, vector<1x32xf32>,
    } else {
    }
    %c12_i32_191 = arith.constant 12 : i32
    %321 = arith.addi %0, %c12_i32_191 : i32
    %322 = arith.index_cast %321 : i32 to index
    %323 = memref.load %arg1[%322] : memref<16xi32, #tpu.memory_space<smem>>
    %c0_i32_192 = arith.constant 0 : i32
    %c12_i32_193 = arith.constant 12 : i32
    %c4_i32_194 = arith.constant 4 : i32
    %c0_i32_195 = arith.constant 0 : i32
    %324 = tpu.memref_slice %arg2[%c0_i32_192, %c0_i32_195] : memref<32x32xf32, #tpu.memory_space<any>> -> memref<1x32xf32, #tpu.memory_space<any>>
    %325 = tpu.memref_squeeze %324 : memref<1x32xf32, #tpu.memory_space<any>> -> memref<32xf32, #tpu.memory_space<any>>
    %c0_i32_196 = arith.constant 0 : i32
    %326 = tpu.memref_slice %arg4[%c12_i32_193, %c0_i32_196] : memref<16x32xf32, #tpu.memory_space<vmem>> -> memref<1x32xf32, #tpu.memory_space<vmem>>
    %327 = tpu.memref_squeeze %326 : memref<1x32xf32, #tpu.memory_space<vmem>> -> memref<32xf32, #tpu.memory_space<vmem>>
    %328 = tpu.memref_slice %arg5[%c4_i32_194] : memref<8x!tpu.dma_semaphore, #tpu.memory_space<semaphore_mem>> -> memref<1x!tpu.dma_semaphore, #tpu.memory_space<semaphore_mem>>
    %329 = tpu.memref_squeeze %328 : memref<1x!tpu.dma_semaphore, #tpu.memory_space<semaphore_mem>> -> memref<!tpu.dma_semaphore, #tpu.memory_space<semaphore_mem>>
    tpu.wait_dma2 semaphore(%329 : memref<!tpu.dma_semaphore, #tpu.memory_space<semaphore_mem>>) src(%325 : memref<32xf32, #tpu.memory_space<any>>) dst(%327 : memref<32xf32, #tpu.memory_space<vmem>>)
    %c0_i32_197 = arith.constant 0 : i32
    %330 = arith.cmpi slt, %323, %c0_i32_197 : i32
    %331 = arith.extui %330 : i1 to i32
    %c0_i32_198 = arith.constant 0 : i32
    %332 = arith.cmpi ne, %331, %c0_i32_198 : i32
    scf.if %332 {
      %cst = arith.constant 0.000000e+00 : f32
      %371 = vector.broadcast %cst : f32 to vector<32xf32>
      %c12 = arith.constant 12 : index
      %c0_226 = arith.constant 0 : index
      %372 = vector.load %arg4[%c12, %c0_226] : memref<16x32xf32, #tpu.memory_space<vmem>>, vector<1x32xf32>
      %373 = vector.shape_cast %372 : vector<1x32xf32> to vector<32xf32>
      %374 = vector.shape_cast %371 : vector<32xf32> to vector<1x32xf32>
      tpu.vector_store %arg4[%c12, %c0_226], %374 {strides = array<i32>} : memref<16x32xf32, #tpu.memory_space<vmem>>, vector<1x32xf32>,
    } else {
    }
    %c13_i32_199 = arith.constant 13 : i32
    %333 = arith.addi %0, %c13_i32_199 : i32
    %334 = arith.index_cast %333 : i32 to index
    %335 = memref.load %arg1[%334] : memref<16xi32, #tpu.memory_space<smem>>
    %c0_i32_200 = arith.constant 0 : i32
    %c13_i32_201 = arith.constant 13 : i32
    %c5_i32_202 = arith.constant 5 : i32
    %c0_i32_203 = arith.constant 0 : i32
    %336 = tpu.memref_slice %arg2[%c0_i32_200, %c0_i32_203] : memref<32x32xf32, #tpu.memory_space<any>> -> memref<1x32xf32, #tpu.memory_space<any>>
    %337 = tpu.memref_squeeze %336 : memref<1x32xf32, #tpu.memory_space<any>> -> memref<32xf32, #tpu.memory_space<any>>
    %c0_i32_204 = arith.constant 0 : i32
    %338 = tpu.memref_slice %arg4[%c13_i32_201, %c0_i32_204] : memref<16x32xf32, #tpu.memory_space<vmem>> -> memref<1x32xf32, #tpu.memory_space<vmem>>
    %339 = tpu.memref_squeeze %338 : memref<1x32xf32, #tpu.memory_space<vmem>> -> memref<32xf32, #tpu.memory_space<vmem>>
    %340 = tpu.memref_slice %arg5[%c5_i32_202] : memref<8x!tpu.dma_semaphore, #tpu.memory_space<semaphore_mem>> -> memref<1x!tpu.dma_semaphore, #tpu.memory_space<semaphore_mem>>
    %341 = tpu.memref_squeeze %340 : memref<1x!tpu.dma_semaphore, #tpu.memory_space<semaphore_mem>> -> memref<!tpu.dma_semaphore, #tpu.memory_space<semaphore_mem>>
    tpu.wait_dma2 semaphore(%341 : memref<!tpu.dma_semaphore, #tpu.memory_space<semaphore_mem>>) src(%337 : memref<32xf32, #tpu.memory_space<any>>) dst(%339 : memref<32xf32, #tpu.memory_space<vmem>>)
    %c0_i32_205 = arith.constant 0 : i32
    %342 = arith.cmpi slt, %335, %c0_i32_205 : i32
    %343 = arith.extui %342 : i1 to i32
    %c0_i32_206 = arith.constant 0 : i32
    %344 = arith.cmpi ne, %343, %c0_i32_206 : i32
    scf.if %344 {
      %cst = arith.constant 0.000000e+00 : f32
      %371 = vector.broadcast %cst : f32 to vector<32xf32>
      %c13 = arith.constant 13 : index
      %c0_226 = arith.constant 0 : index
      %372 = vector.load %arg4[%c13, %c0_226] : memref<16x32xf32, #tpu.memory_space<vmem>>, vector<1x32xf32>
      %373 = vector.shape_cast %372 : vector<1x32xf32> to vector<32xf32>
      %374 = vector.shape_cast %371 : vector<32xf32> to vector<1x32xf32>
      tpu.vector_store %arg4[%c13, %c0_226], %374 {strides = array<i32>} : memref<16x32xf32, #tpu.memory_space<vmem>>, vector<1x32xf32>,
    } else {
    }
    %c14_i32_207 = arith.constant 14 : i32
    %345 = arith.addi %0, %c14_i32_207 : i32
    %346 = arith.index_cast %345 : i32 to index
    %347 = memref.load %arg1[%346] : memref<16xi32, #tpu.memory_space<smem>>
    %c0_i32_208 = arith.constant 0 : i32
    %c14_i32_209 = arith.constant 14 : i32
    %c6_i32_210 = arith.constant 6 : i32
    %c0_i32_211 = arith.constant 0 : i32
    %348 = tpu.memref_slice %arg2[%c0_i32_208, %c0_i32_211] : memref<32x32xf32, #tpu.memory_space<any>> -> memref<1x32xf32, #tpu.memory_space<any>>
    %349 = tpu.memref_squeeze %348 : memref<1x32xf32, #tpu.memory_space<any>> -> memref<32xf32, #tpu.memory_space<any>>
    %c0_i32_212 = arith.constant 0 : i32
    %350 = tpu.memref_slice %arg4[%c14_i32_209, %c0_i32_212] : memref<16x32xf32, #tpu.memory_space<vmem>> -> memref<1x32xf32, #tpu.memory_space<vmem>>
    %351 = tpu.memref_squeeze %350 : memref<1x32xf32, #tpu.memory_space<vmem>> -> memref<32xf32, #tpu.memory_space<vmem>>
    %352 = tpu.memref_slice %arg5[%c6_i32_210] : memref<8x!tpu.dma_semaphore, #tpu.memory_space<semaphore_mem>> -> memref<1x!tpu.dma_semaphore, #tpu.memory_space<semaphore_mem>>
    %353 = tpu.memref_squeeze %352 : memref<1x!tpu.dma_semaphore, #tpu.memory_space<semaphore_mem>> -> memref<!tpu.dma_semaphore, #tpu.memory_space<semaphore_mem>>
    tpu.wait_dma2 semaphore(%353 : memref<!tpu.dma_semaphore, #tpu.memory_space<semaphore_mem>>) src(%349 : memref<32xf32, #tpu.memory_space<any>>) dst(%351 : memref<32xf32, #tpu.memory_space<vmem>>)
    %c0_i32_213 = arith.constant 0 : i32
    %354 = arith.cmpi slt, %347, %c0_i32_213 : i32
    %355 = arith.extui %354 : i1 to i32
    %c0_i32_214 = arith.constant 0 : i32
    %356 = arith.cmpi ne, %355, %c0_i32_214 : i32
    scf.if %356 {
      %cst = arith.constant 0.000000e+00 : f32
      %371 = vector.broadcast %cst : f32 to vector<32xf32>
      %c14 = arith.constant 14 : index
      %c0_226 = arith.constant 0 : index
      %372 = vector.load %arg4[%c14, %c0_226] : memref<16x32xf32, #tpu.memory_space<vmem>>, vector<1x32xf32>
      %373 = vector.shape_cast %372 : vector<1x32xf32> to vector<32xf32>
      %374 = vector.shape_cast %371 : vector<32xf32> to vector<1x32xf32>
      tpu.vector_store %arg4[%c14, %c0_226], %374 {strides = array<i32>} : memref<16x32xf32, #tpu.memory_space<vmem>>, vector<1x32xf32>,
    } else {
    }
    %c15_i32_215 = arith.constant 15 : i32
    %357 = arith.addi %0, %c15_i32_215 : i32
    %358 = arith.index_cast %357 : i32 to index
    %359 = memref.load %arg1[%358] : memref<16xi32, #tpu.memory_space<smem>>
    %c0_i32_216 = arith.constant 0 : i32
    %c15_i32_217 = arith.constant 15 : i32
    %c7_i32_218 = arith.constant 7 : i32
    %c0_i32_219 = arith.constant 0 : i32
    %360 = tpu.memref_slice %arg2[%c0_i32_216, %c0_i32_219] : memref<32x32xf32, #tpu.memory_space<any>> -> memref<1x32xf32, #tpu.memory_space<any>>
    %361 = tpu.memref_squeeze %360 : memref<1x32xf32, #tpu.memory_space<any>> -> memref<32xf32, #tpu.memory_space<any>>
    %c0_i32_220 = arith.constant 0 : i32
    %362 = tpu.memref_slice %arg4[%c15_i32_217, %c0_i32_220] : memref<16x32xf32, #tpu.memory_space<vmem>> -> memref<1x32xf32, #tpu.memory_space<vmem>>
    %363 = tpu.memref_squeeze %362 : memref<1x32xf32, #tpu.memory_space<vmem>> -> memref<32xf32, #tpu.memory_space<vmem>>
    %364 = tpu.memref_slice %arg5[%c7_i32_218] : memref<8x!tpu.dma_semaphore, #tpu.memory_space<semaphore_mem>> -> memref<1x!tpu.dma_semaphore, #tpu.memory_space<semaphore_mem>>
    %365 = tpu.memref_squeeze %364 : memref<1x!tpu.dma_semaphore, #tpu.memory_space<semaphore_mem>> -> memref<!tpu.dma_semaphore, #tpu.memory_space<semaphore_mem>>
    tpu.wait_dma2 semaphore(%365 : memref<!tpu.dma_semaphore, #tpu.memory_space<semaphore_mem>>) src(%361 : memref<32xf32, #tpu.memory_space<any>>) dst(%363 : memref<32xf32, #tpu.memory_space<vmem>>)
    %c0_i32_221 = arith.constant 0 : i32
    %366 = arith.cmpi slt, %359, %c0_i32_221 : i32
    %367 = arith.extui %366 : i1 to i32
    %c0_i32_222 = arith.constant 0 : i32
    %368 = arith.cmpi ne, %367, %c0_i32_222 : i32
    scf.if %368 {
      %cst = arith.constant 0.000000e+00 : f32
      %371 = vector.broadcast %cst : f32 to vector<32xf32>
      %c15 = arith.constant 15 : index
      %c0_226 = arith.constant 0 : index
      %372 = vector.load %arg4[%c15, %c0_226] : memref<16x32xf32, #tpu.memory_space<vmem>>, vector<1x32xf32>
      %373 = vector.shape_cast %372 : vector<1x32xf32> to vector<32xf32>
      %374 = vector.shape_cast %371 : vector<32xf32> to vector<1x32xf32>
      tpu.vector_store %arg4[%c15, %c0_226], %374 {strides = array<i32>} : memref<16x32xf32, #tpu.memory_space<vmem>>, vector<1x32xf32>,
    } else {
    }
    %c0 = arith.constant 0 : index
    %c0_223 = arith.constant 0 : index
    %369 = vector.load %arg4[%c0, %c0_223] : memref<16x32xf32, #tpu.memory_space<vmem>>, vector<16x32xf32>
    %c0_224 = arith.constant 0 : index
    %c0_225 = arith.constant 0 : index
    %370 = vector.load %arg3[%c0_224, %c0_225] : memref<16x32xf32, #tpu.memory_space<vmem>>, vector<16x32xf32>
    tpu.vector_store %arg3[%c0_224, %c0_225], %369 {strides = array<i32>} : memref<16x32xf32, #tpu.memory_space<vmem>>, vector<16x32xf32>,
    return
  }
  func.func @transform_1(%arg0: i32, %arg1: memref<16xi32, #tpu.memory_space<smem>>) -> (i32, i32) {
    %c0_i32 = arith.constant 0 : i32
    %c0_i32_0 = arith.constant 0 : i32
    return %arg0, %c0_i32 : i32, i32
  }
}

</mosaic_0001>

<bundles_post_ra>
// kernel: tpu_custom_call.1
= control target key start
LH: loop header
LB: loop body
LE: loop exit
PB: predicated region body
PF: predicated region fallthrough
CT: control target
= control target key end

     0   :  { %s1254_s12 = smov [#allocation5]   ;;  %s1490_s0 = inlined_call_operand.hbm [shape: s32[16], index: 0, kind: input, shape index: {}]   ;;  %s1491_s1 = inlined_call_operand.hbm [shape: f32[32,32], index: 1, kind: input, shape index: {}]   ;;  %s1492_s2 = inlined_call_operand.hbm [shape: f32[16,32], index: 2, kind: output, shape index: {}]  }
   0x1   :  { %s8_s11 = sshll.u32 %s1490_s0, 4  ;;  %s9_s11 = int_to_ptr.hbm [resolvable:$true] %s8_s11 }
   0x2   :  { %11 = dma.hbm_to_smem %s9_s11, 16, %s1254_s12, [#allocation4] }
   0x3   :  { %1218 = dma.done.wait [#allocation4], 16 }
   0x4   :  { %1219 = vsyncadd [#allocation4], 4294967280 }
   0x5   :  { %14 = sfence }
   0x6   :  { %15 = vsyncpa [#allocation7], 0  ;;  %s1308_s13 = sld [smem:[#allocation5]]  ;;  %s1255_s14 = smov [#allocation2]  }
   0x7   :  { %s1310_s15 = sshll.u32 %s1255_s14, 4  ;;  %s601_s16 = sld [smem:[#allocation5 + $0x1]]  ;;  %s33_s15 = int_to_ptr.vmem [resolvable:$true] %s1310_s15 }
   0x8   :  { %s1256_s17 = smov [#allocation2 + $0x1]   ;;  %s1315_s18 = sld [smem:[#allocation5 + $0x2]] }
   0x9   :  { %s1313_s0 = sshll.u32 %s1256_s17, 4  ;;  %s1257_s19 = smov [#allocation2 + $0x2]   ;;  %s55_s0 = int_to_ptr.vmem [resolvable:$true] %s1313_s0 }
   0xa   :  { %s1318_s20 = sshll.u32 %s1257_s19, 4  ;;  %s1320_s21 = sld [smem:[#allocation5 + $0x3]]  ;;  %s77_s20 = int_to_ptr.vmem [resolvable:$true] %s1318_s20 }
   0xb   :  { %s1335_s7 = scalar_lea.hbm %s1491_s1, 32 }
   0xc   :  { %p18_p0 = scmp.gt.s32.totalorder %s1308_s13, 0  ;;  %p596_p1 = scmp.lt.s32.totalorder %s1308_s13, 31 }
   0xd   :  { %p38_p2 = scmp.gt.s32.totalorder %s601_s16, 0  ;;  %p602_p3 = scmp.lt.s32.totalorder %s601_s16, 31 }
   0xe   :  { %s19_s22 = scalar_select %p18_p0, %s1308_s13, 0 }
   0xf   :  { %s1494_s16 = smov (!%p38_p2, %s601_s16), 0  ;;  %p60_p4 = scmp.gt.s32.totalorder %s1315_s18, 0 }
  0x10   :  { %s1496_s22 = smov (!%p596_p1, %s19_s22), 31  ;;  %s1498_s16 = smov (!%p602_p3, %s1494_s16), 31 }
  0x11   :  { %s22_s25 = scalar_lea.hbm %s1491_s1, %s1496_s22  ;;  %s42_s29 = scalar_lea.hbm %s1491_s1, %s1498_s16 }
  0x12   :  { %s30_s26 = sshll.u32 %s22_s25, 4  ;;  %s52_s30 = sshll.u32 %s42_s29, 4  ;;  %s31_s26 = int_to_ptr.hbm [resolvable:$true] %s30_s26  ;;  %s53_s30 = int_to_ptr.hbm [resolvable:$true] %s52_s30 }
  0x13   :  { %s810_s3 = sshra.s32 %s31_s26, 4  ;;  %s811_s3 = int_to_ptr.hbm [resolvable:$true] %s810_s3 }
  0x14   :  { %s812_s4 = scalar_lea.hbm %s811_s3, 1  ;;  %p815_p6 = scmp.lt.s32.totalorder %s811_s3, %s1491_s1 }
  0x15   :  { %p813_p5 = scmp.ne.s32.totalorder %s811_s3, %s812_s4  ;;  %p816_p7 = scmp.lt.s32.totalorder %s1335_s7, %s812_s4 }
  0x17   :  { %p817_p8 = por %p816_p7, %p815_p6 }
  0x19   :  { %p818_p9 = pnand %p817_p8, %p813_p5 }
  0x1b   :  { %821 = shalt.err (!%p818_p9)  }
  0x1c   :  { %35 = dma.hbm_to_vmem [thread:$0]  %s31_s26, 16, %s33_s15, [#allocation3] }
  0x1d   :  { %p608_p10 = scmp.lt.s32.totalorder %s1315_s18, 31  ;;  %s834_s10 = sshra.s32 %s53_s30, 4  ;;  %s835_s10 = int_to_ptr.hbm [resolvable:$true] %s834_s10 }
  0x1e   :  { %s836_s11 = scalar_lea.hbm %s835_s10, 1  ;;  %p839_p12 = scmp.lt.s32.totalorder %s835_s10, %s1491_s1 }
  0x1f   :  { %p837_p11 = scmp.ne.s32.totalorder %s835_s10, %s836_s11  ;;  %p840_p13 = scmp.lt.s32.totalorder %s1335_s7, %s836_s11 }
  0x21   :  { %p841_p0 = por %p840_p13, %p839_p12 }
  0x23   :  { %p842_p1 = pnand %p841_p0, %p837_p11 }
  0x25   :  { %845 = shalt.err (!%p842_p1)  }
  0x26   :  { %57 = dma.hbm_to_vmem [thread:$0]  %s53_s30, 16, %s55_s0, [#allocation3 + $0x1] }
  0x27   :  { %s61_s15 = scalar_select %p60_p4, %s1315_s18, 0 }
  0x28   :  { %p82_p2 = scmp.gt.s32.totalorder %s1320_s21, 0  ;;  %p614_p3 = scmp.lt.s32.totalorder %s1320_s21, 31 }
  0x29   :  { %s1500_s15 = smov (!%p608_p10, %s61_s15), 31  ;;  %s1258_s24 = smov [#allocation2 + $0x3]  }
  0x2a   :  { %s83_s16 = scalar_select %p82_p2, %s1320_s21, 0 }
  0x2b   :  { %s64_s22 = scalar_lea.hbm %s1491_s1, %s1500_s15  ;;  %s1362_s25 = sshll.u32 %s1258_s24, 4  ;;  %s99_s25 = int_to_ptr.vmem [resolvable:$true] %s1362_s25 }
  0x2c   :  { %s74_s23 = sshll.u32 %s64_s22, 4  ;;  %s75_s23 = int_to_ptr.hbm [resolvable:$true] %s74_s23 }
  0x2d   :  { %s858_s26 = sshra.s32 %s75_s23, 4  ;;  %s859_s26 = int_to_ptr.hbm [resolvable:$true] %s858_s26 }
  0x2e   :  { %s860_s0 = scalar_lea.hbm %s859_s26, 1  ;;  %p863_p5 = scmp.lt.s32.totalorder %s859_s26, %s1491_s1 }
  0x2f   :  { %p861_p4 = scmp.ne.s32.totalorder %s859_s26, %s860_s0  ;;  %p864_p6 = scmp.lt.s32.totalorder %s1335_s7, %s860_s0 }
  0x31   :  { %p865_p7 = por %p864_p6, %p863_p5 }
  0x33   :  { %p866_p8 = pnand %p865_p7, %p861_p4 }
  0x35   :  { %869 = shalt.err (!%p866_p8)  }
  0x36   :  { %79 = dma.hbm_to_vmem [thread:$0]  %s75_s23, 16, %s77_s20, [#allocation3 + $0x2] }
  0x37   :  { %s1502_s16 = smov (!%p614_p3, %s83_s16), 31  ;;  %s619_s18 = sld [smem:[#allocation5 + $0x4]] }
  0x38   :  { %s86_s3 = scalar_lea.hbm %s1491_s1, %s1502_s16  ;;  %s1259_s5 = smov [#allocation2 + $0x4]  }
  0x39   :  { %s96_s4 = sshll.u32 %s86_s3, 4  ;;  %s1374_s6 = sshll.u32 %s1259_s5, 4  ;;  %s97_s4 = int_to_ptr.hbm [resolvable:$true] %s96_s4  ;;  %s121_s6 = int_to_ptr.vmem [resolvable:$true] %s1374_s6 }
  0x3a   :  { %s882_s8 = sshra.s32 %s97_s4, 4  ;;  %s883_s8 = int_to_ptr.hbm [resolvable:$true] %s882_s8 }
  0x3b   :  { %s884_s20 = scalar_lea.hbm %s883_s8, 1  ;;  %p887_p10 = scmp.lt.s32.totalorder %s883_s8, %s1491_s1 }
  0x3c   :  { %p885_p9 = scmp.ne.s32.totalorder %s883_s8, %s884_s20  ;;  %p888_p11 = scmp.lt.s32.totalorder %s1335_s7, %s884_s20 }
  0x3e   :  { %p889_p12 = por %p888_p11, %p887_p10 }
  0x40   :  { %p890_p13 = pnand %p889_p12, %p885_p9 }
  0x42   :  { %893 = shalt.err (!%p890_p13)  }
  0x43   :  { %101 = dma.hbm_to_vmem [thread:$0]  %s97_s4, 16, %s99_s25, [#allocation3 + $0x3] }
  0x44   :  { %s1381_s10 = sld [smem:[#allocation5 + $0x5]]  ;;  %p104_p0 = scmp.gt.s32.totalorder %s619_s18, 0 }
  0x45   :  { %p620_p1 = scmp.lt.s32.totalorder %s619_s18, 31  ;;  %s1260_s11 = smov [#allocation2 + $0x5]  }
  0x46   :  { %s1383_s12 = sshll.u32 %s1260_s11, 4  ;;  %s631_s14 = sld [smem:[#allocation5 + $0x6]]  ;;  %s143_s12 = int_to_ptr.vmem [resolvable:$true] %s1383_s12 }
  0x47   :  { %s1504_s18 = smov (!%p104_p0, %s619_s18), 0  ;;  %s1261_s19 = smov [#allocation2 + $0x6]  }
  0x48   :  { %s1506_s18 = smov (!%p620_p1, %s1504_s18), 31  ;;  %s1391_s22 = sshll.u32 %s1261_s19, 4  ;;  %s165_s22 = int_to_ptr.vmem [resolvable:$true] %s1391_s22 }
  0x49   :  { %s108_s17 = scalar_lea.hbm %s1491_s1, %s1506_s18 }
  0x4a   :  { %p126_p2 = scmp.gt.s32.totalorder %s1381_s10, 0  ;;  %p626_p3 = scmp.lt.s32.totalorder %s1381_s10, 31 }
  0x4b   :  { %s118_s23 = sshll.u32 %s108_s17, 4  ;;  %s119_s23 = int_to_ptr.hbm [resolvable:$true] %s118_s23 }
  0x4c   :  { %p148_p4 = scmp.gt.s32.totalorder %s631_s14, 0  ;;  %p632_p5 = scmp.lt.s32.totalorder %s631_s14, 31 }
  0x4d   :  { %s906_s24 = sshra.s32 %s119_s23, 4  ;;  %s907_s24 = int_to_ptr.hbm [resolvable:$true] %s906_s24 }
  0x4e   :  { %s908_s25 = scalar_lea.hbm %s907_s24, 1  ;;  %p911_p7 = scmp.lt.s32.totalorder %s907_s24, %s1491_s1 }
  0x4f   :  { %p909_p6 = scmp.ne.s32.totalorder %s907_s24, %s908_s25  ;;  %p912_p8 = scmp.lt.s32.totalorder %s1335_s7, %s908_s25 }
  0x51   :  { %p913_p9 = por %p912_p8, %p911_p7 }
  0x53   :  { %p914_p10 = pnand %p913_p9, %p909_p6 }
  0x55   :  { %917 = shalt.err (!%p914_p10)  }
  0x56   :  { %123 = dma.hbm_to_vmem [thread:$0]  %s119_s23, 16, %s121_s6, [#allocation3 + $0x4] }
  0x57   :  { %s127_s27 = scalar_select %p126_p2, %s1381_s10, 0 }
  0x58   :  { %s149_s28 = scalar_select %p148_p4, %s631_s14, 0 }
  0x59   :  { %s1508_s27 = smov (!%p626_p3, %s127_s27), 31 }
  0x5a   :  { %s1510_s28 = smov (!%p632_p5, %s149_s28), 31  ;;  %s130_s30 = scalar_lea.hbm %s1491_s1, %s1508_s27 }
  0x5b   :  { %s140_s3 = sshll.u32 %s130_s30, 4  ;;  %s152_s8 = scalar_lea.hbm %s1491_s1, %s1510_s28  ;;  %s141_s3 = int_to_ptr.hbm [resolvable:$true] %s140_s3 }
  0x5c   :  { %s162_s6 = sshll.u32 %s152_s8, 4  ;;  %s930_s20 = sshra.s32 %s141_s3, 4  ;;  %s931_s20 = int_to_ptr.hbm [resolvable:$true] %s930_s20  ;;  %s163_s6 = int_to_ptr.hbm [resolvable:$true] %s162_s6 }
  0x5d   :  { %s932_s21 = scalar_lea.hbm %s931_s20, 1  ;;  %p935_p12 = scmp.lt.s32.totalorder %s931_s20, %s1491_s1 }
  0x5e   :  { %p933_p11 = scmp.ne.s32.totalorder %s931_s20, %s932_s21  ;;  %p936_p13 = scmp.lt.s32.totalorder %s1335_s7, %s932_s21 }
  0x60   :  { %p937_p0 = por %p936_p13, %p935_p12 }
  0x62   :  { %p938_p1 = pnand %p937_p0, %p933_p11 }
  0x64   :  { %941 = shalt.err (!%p938_p1)  }
  0x65   :  { %145 = dma.hbm_to_vmem [thread:$0]  %s141_s3, 16, %s143_s12, [#allocation3 + $0x5] }
  0x66   :  { %s637_s11 = sld [smem:[#allocation5 + $0x7]]  ;;  %s954_s14 = sshra.s32 %s163_s6, 4  ;;  %s955_s14 = int_to_ptr.hbm [resolvable:$true] %s954_s14 }
  0x67   :  { %s956_s15 = scalar_lea.hbm %s955_s14, 1  ;;  %p959_p3 = scmp.lt.s32.totalorder %s955_s14, %s1491_s1 }
  0x68   :  { %p957_p2 = scmp.ne.s32.totalorder %s955_s14, %s956_s15  ;;  %p960_p4 = scmp.lt.s32.totalorder %s1335_s7, %s956_s15 }
  0x6a   :  { %p961_p5 = por %p960_p4, %p959_p3 }
  0x6c   :  { %p962_p6 = pnand %p961_p5, %p957_p2 }
  0x6e   :  { %965 = shalt.err (!%p962_p6)  }
  0x6f   :  { %167 = dma.hbm_to_vmem [thread:$0]  %s163_s6, 16, %s165_s22, [#allocation3 + $0x6] }
  0x70   :  { %p170_p7 = scmp.gt.s32.totalorder %s637_s11, 0  ;;  %p638_p8 = scmp.lt.s32.totalorder %s637_s11, 31 }
  0x71   :  { %s1262_s12 = smov [#allocation2 + $0x7]  }
  0x72   :  { %s1512_s11 = smov (!%p170_p7, %s637_s11), 0  ;;  %s186_s19 = sshll.u32 %s1262_s12, 4  ;;  %s187_s19 = int_to_ptr.vmem [resolvable:$true] %s186_s19 }
  0x73   :  { %s1514_s11 = smov (!%p638_p8, %s1512_s11), 31 }
  0x74   :  { %s174_s25 = scalar_lea.hbm %s1491_s1, %s1514_s11 }
  0x75   :  { %s184_s26 = sshll.u32 %s174_s25, 4  ;;  %s185_s26 = int_to_ptr.hbm [resolvable:$true] %s184_s26 }
  0x76   :  { %s978_s0 = sshra.s32 %s185_s26, 4  ;;  %s979_s0 = int_to_ptr.hbm [resolvable:$true] %s978_s0 }
  0x77   :  { %s980_s27 = scalar_lea.hbm %s979_s0, 1  ;;  %p983_p10 = scmp.lt.s32.totalorder %s979_s0, %s1491_s1 }
  0x78   :  { %p981_p9 = scmp.ne.s32.totalorder %s979_s0, %s980_s27  ;;  %p984_p11 = scmp.lt.s32.totalorder %s1335_s7, %s980_s27 }
  0x7a   :  { %p985_p12 = por %p984_p11, %p983_p10 }
  0x7c   :  { %p986_p13 = pnand %p985_p12, %p981_p9 }
  0x7e   :  { %989 = shalt.err (!%p986_p13)  }
  0x7f   :  { %189 = dma.hbm_to_vmem [thread:$0]  %s185_s26, 16, %s187_s19, [#allocation3 + $0x7] }
  0x80   :  { %1220 = dma.done.wait [#allocation3], 16 }
  0x81   :  { %1221 = vsyncadd [#allocation3], 4294967280  ;;  %p643_p0 = scmp.ge.s32.totalorder %s1308_s13, 0 }
  0x83   :  { %196 = sbr.rel (%p643_p0) target bundleno = 138 (0x8a), region = 37 }
  0x88   :  { %vm197_vm0 = vcmask 253952   ;;  %v1263_v0 = vmov 0.0  }
  0x89   :  { %198 = vst.msk [vmem:[#allocation2] sm:$0x1] %vm197_vm0, %v1263_v0 }
  0x8a PF:  { %s644_s18 = sld [smem:[#allocation5 + $0x8]]  ;;  %s1264_s30 = smov [#allocation2 + $0x8]  }
  0x8b   :  { %s650_s29 = sld [smem:[#allocation5 + $0x1]]  ;;  %s216_s3 = sshll.u32 %s1264_s30, 4  ;;  %s217_s3 = int_to_ptr.vmem [resolvable:$true] %s216_s3 }
  0x90   :  { %p201_p1 = scmp.gt.s32.totalorder %s644_s18, 0  ;;  %p645_p2 = scmp.lt.s32.totalorder %s644_s18, 31 }
  0x92   :  { %s1516_s18 = smov (!%p201_p1, %s644_s18), 0 }
  0x93   :  { %s1518_s18 = smov (!%p645_p2, %s1516_s18), 31 }
  0x94   :  { %s205_s8 = scalar_lea.hbm %s1491_s1, %s1518_s18 }
  0x95   :  { %s214_s13 = sshll.u32 %s205_s8, 4  ;;  %s215_s13 = int_to_ptr.hbm [resolvable:$true] %s214_s13 }
  0x96   :  { %s1002_s6 = sshra.s32 %s215_s13, 4  ;;  %s1003_s6 = int_to_ptr.hbm [resolvable:$true] %s1002_s6 }
  0x97   :  { %s1004_s20 = scalar_lea.hbm %s1003_s6, 1  ;;  %p1007_p4 = scmp.lt.s32.totalorder %s1003_s6, %s1491_s1 }
  0x98   :  { %p1005_p3 = scmp.ne.s32.totalorder %s1003_s6, %s1004_s20  ;;  %p1008_p5 = scmp.lt.s32.totalorder %s1335_s7, %s1004_s20 }
  0x9a   :  { %p1009_p6 = por %p1008_p5, %p1007_p4 }
  0x9c   :  { %p1010_p7 = pnand %p1009_p6, %p1005_p3 }
  0x9e   :  { %1013 = shalt.err (!%p1010_p7)  }
  0x9f   :  { %219 = dma.hbm_to_vmem [thread:$0]  %s215_s13, 16, %s217_s3, [#allocation3] }
  0xa0   :  { %1222 = dma.done.wait [#allocation3 + $0x1], 16 }
  0xa1   :  { %1223 = vsyncadd [#allocation3 + $0x1], 4294967280  ;;  %p651_p8 = scmp.ge.s32.totalorder %s650_s29, 0 }
  0xa3   :  { %226 = sbr.rel (%p651_p8) target bundleno = 170 (0xaa), region = 45 }
  0xa8   :  { %vm227_vm1 = vcmask 253952   ;;  %v1265_v1 = vmov 0.0  }
  0xa9   :  { %228 = vst.msk [vmem:[#allocation2 + $0x1] sm:$0x1] %vm227_vm1, %v1265_v1 }
  0xaa PF:  { %s652_s10 = sld [smem:[#allocation5 + $0x9]]  ;;  %s1266_s14 = smov [#allocation2 + $0x9]  }
  0xab   :  { %s658_s11 = sld [smem:[#allocation5 + $0x2]]  ;;  %s246_s15 = sshll.u32 %s1266_s14, 4  ;;  %s247_s15 = int_to_ptr.vmem [resolvable:$true] %s246_s15 }
  0xb0   :  { %p231_p9 = scmp.gt.s32.totalorder %s652_s10, 0  ;;  %p653_p10 = scmp.lt.s32.totalorder %s652_s10, 31 }
  0xb2   :  { %s1520_s10 = smov (!%p231_p9, %s652_s10), 0 }
  0xb3   :  { %s1522_s10 = smov (!%p653_p10, %s1520_s10), 31 }
  0xb4   :  { %s235_s12 = scalar_lea.hbm %s1491_s1, %s1522_s10 }
  0xb5   :  { %s244_s19 = sshll.u32 %s235_s12, 4  ;;  %s245_s19 = int_to_ptr.hbm [resolvable:$true] %s244_s19 }
  0xb6   :  { %s1026_s23 = sshra.s32 %s245_s19, 4  ;;  %s1027_s23 = int_to_ptr.hbm [resolvable:$true] %s1026_s23 }
  0xb7   :  { %s1028_s24 = scalar_lea.hbm %s1027_s23, 1  ;;  %p1031_p12 = scmp.lt.s32.totalorder %s1027_s23, %s1491_s1 }
  0xb8   :  { %p1029_p11 = scmp.ne.s32.totalorder %s1027_s23, %s1028_s24  ;;  %p1032_p13 = scmp.lt.s32.totalorder %s1335_s7, %s1028_s24 }
  0xba   :  { %p1033_p0 = por %p1032_p13, %p1031_p12 }
  0xbc   :  { %p1034_p1 = pnand %p1033_p0, %p1029_p11 }
  0xbe   :  { %1037 = shalt.err (!%p1034_p1)  }
  0xbf   :  { %249 = dma.hbm_to_vmem [thread:$0]  %s245_s19, 16, %s247_s15, [#allocation3 + $0x1] }
  0xc0   :  { %1224 = dma.done.wait [#allocation3 + $0x2], 16 }
  0xc1   :  { %1225 = vsyncadd [#allocation3 + $0x2], 4294967280  ;;  %p659_p2 = scmp.ge.s32.totalorder %s658_s11, 0 }
  0xc3   :  { %256 = sbr.rel (%p659_p2) target bundleno = 202 (0xca), region = 53 }
  0xc8   :  { %vm257_vm2 = vcmask 253952   ;;  %v1267_v2 = vmov 0.0  }
  0xc9   :  { %258 = vst.msk [vmem:[#allocation2 + $0x2] sm:$0x1] %vm257_vm2, %v1267_v2 }
  0xca PF:  { %s660_s0 = sld [smem:[#allocation5 + $0xa]]  ;;  %s1268_s28 = smov [#allocation2 + $0xa]  }
  0xcb   :  { %s666_s27 = sld [smem:[#allocation5 + $0x3]]  ;;  %s276_s22 = sshll.u32 %s1268_s28, 4  ;;  %s277_s22 = int_to_ptr.vmem [resolvable:$true] %s276_s22 }
  0xd0   :  { %p261_p3 = scmp.gt.s32.totalorder %s660_s0, 0  ;;  %p661_p4 = scmp.lt.s32.totalorder %s660_s0, 31 }
  0xd2   :  { %s1524_s0 = smov (!%p261_p3, %s660_s0), 0 }
  0xd3   :  { %s1526_s0 = smov (!%p661_p4, %s1524_s0), 31 }
  0xd4   :  { %s265_s30 = scalar_lea.hbm %s1491_s1, %s1526_s0 }
  0xd5   :  { %s274_s3 = sshll.u32 %s265_s30, 4  ;;  %s275_s3 = int_to_ptr.hbm [resolvable:$true] %s274_s3 }
  0xd6   :  { %s1050_s4 = sshra.s32 %s275_s3, 4  ;;  %s1051_s4 = int_to_ptr.hbm [resolvable:$true] %s1050_s4 }
  0xd7   :  { %s1052_s5 = scalar_lea.hbm %s1051_s4, 1  ;;  %p1055_p6 = scmp.lt.s32.totalorder %s1051_s4, %s1491_s1 }
  0xd8   :  { %p1053_p5 = scmp.ne.s32.totalorder %s1051_s4, %s1052_s5  ;;  %p1056_p7 = scmp.lt.s32.totalorder %s1335_s7, %s1052_s5 }
  0xda   :  { %p1057_p8 = por %p1056_p7, %p1055_p6 }
  0xdc   :  { %p1058_p9 = pnand %p1057_p8, %p1053_p5 }
  0xde   :  { %1061 = shalt.err (!%p1058_p9)  }
  0xdf   :  { %279 = dma.hbm_to_vmem [thread:$0]  %s275_s3, 16, %s277_s22, [#allocation3 + $0x2] }
  0xe0   :  { %1226 = dma.done.wait [#allocation3 + $0x3], 16 }
  0xe1   :  { %1227 = vsyncadd [#allocation3 + $0x3], 4294967280  ;;  %p667_p10 = scmp.ge.s32.totalorder %s666_s27, 0 }
  0xe3   :  { %286 = sbr.rel (%p667_p10) target bundleno = 234 (0xea), region = 61 }
  0xe8   :  { %vm287_vm3 = vcmask 253952   ;;  %v1269_v3 = vmov 0.0  }
  0xe9   :  { %288 = vst.msk [vmem:[#allocation2 + $0x3] sm:$0x1] %vm287_vm3, %v1269_v3 }
  0xea PF:  { %s668_s6 = sld [smem:[#allocation5 + $0xb]]  ;;  %s1270_s21 = smov [#allocation2 + $0xb]  }
  0xeb   :  { %s674_s20 = sld [smem:[#allocation5 + $0x4]]  ;;  %s306_s9 = sshll.u32 %s1270_s21, 4  ;;  %s307_s9 = int_to_ptr.vmem [resolvable:$true] %s306_s9 }
  0xf0   :  { %p291_p11 = scmp.gt.s32.totalorder %s668_s6, 0  ;;  %p669_p12 = scmp.lt.s32.totalorder %s668_s6, 31 }
  0xf2   :  { %s1528_s6 = smov (!%p291_p11, %s668_s6), 0 }
  0xf3   :  { %s1530_s6 = smov (!%p669_p12, %s1528_s6), 31 }
  0xf4   :  { %s295_s14 = scalar_lea.hbm %s1491_s1, %s1530_s6 }
  0xf5   :  { %s304_s15 = sshll.u32 %s295_s14, 4  ;;  %s305_s15 = int_to_ptr.hbm [resolvable:$true] %s304_s15 }
  0xf6   :  { %s1074_s16 = sshra.s32 %s305_s15, 4  ;;  %s1075_s16 = int_to_ptr.hbm [resolvable:$true] %s1074_s16 }
  0xf7   :  { %s1076_s17 = scalar_lea.hbm %s1075_s16, 1  ;;  %p1079_p0 = scmp.lt.s32.totalorder %s1075_s16, %s1491_s1 }
  0xf8   :  { %p1077_p13 = scmp.ne.s32.totalorder %s1075_s16, %s1076_s17  ;;  %p1080_p1 = scmp.lt.s32.totalorder %s1335_s7, %s1076_s17 }
  0xfa   :  { %p1081_p2 = por %p1080_p1, %p1079_p0 }
  0xfc   :  { %p1082_p3 = pnand %p1081_p2, %p1077_p13 }
  0xfe   :  { %1085 = shalt.err (!%p1082_p3)  }
  0xff   :  { %309 = dma.hbm_to_vmem [thread:$0]  %s305_s15, 16, %s307_s9, [#allocation3 + $0x3] }
 0x100   :  { %1228 = dma.done.wait [#allocation3 + $0x4], 16 }
 0x101   :  { %1229 = vsyncadd [#allocation3 + $0x4], 4294967280  ;;  %p675_p4 = scmp.ge.s32.totalorder %s674_s20, 0 }
 0x103   :  { %316 = sbr.rel (%p675_p4) target bundleno = 266 (0x10a), region = 69 }
 0x108   :  { %vm317_vm4 = vcmask 253952   ;;  %v1271_v4 = vmov 0.0  }
 0x109   :  { %318 = vst.msk [vmem:[#allocation2 + $0x4] sm:$0x1] %vm317_vm4, %v1271_v4 }
 0x10a PF:  { %s676_s23 = sld [smem:[#allocation5 + $0xc]]  ;;  %s1272_s25 = smov [#allocation2 + $0xc]  }
 0x10b   :  { %s682_s24 = sld [smem:[#allocation5 + $0x5]]  ;;  %s336_s26 = sshll.u32 %s1272_s25, 4  ;;  %s337_s26 = int_to_ptr.vmem [resolvable:$true] %s336_s26 }
 0x110   :  { %p321_p5 = scmp.gt.s32.totalorder %s676_s23, 0  ;;  %p677_p6 = scmp.lt.s32.totalorder %s676_s23, 31 }
 0x112   :  { %s1532_s23 = smov (!%p321_p5, %s676_s23), 0 }
 0x113   :  { %s1534_s23 = smov (!%p677_p6, %s1532_s23), 31 }
 0x114   :  { %s325_s28 = scalar_lea.hbm %s1491_s1, %s1534_s23 }
 0x115   :  { %s334_s22 = sshll.u32 %s325_s28, 4  ;;  %s335_s22 = int_to_ptr.hbm [resolvable:$true] %s334_s22 }
 0x116   :  { %s1098_s18 = sshra.s32 %s335_s22, 4  ;;  %s1099_s18 = int_to_ptr.hbm [resolvable:$true] %s1098_s18 }
 0x117   :  { %s1100_s29 = scalar_lea.hbm %s1099_s18, 1  ;;  %p1103_p8 = scmp.lt.s32.totalorder %s1099_s18, %s1491_s1 }
 0x118   :  { %p1101_p7 = scmp.ne.s32.totalorder %s1099_s18, %s1100_s29  ;;  %p1104_p9 = scmp.lt.s32.totalorder %s1335_s7, %s1100_s29 }
 0x11a   :  { %p1105_p10 = por %p1104_p9, %p1103_p8 }
 0x11c   :  { %p1106_p11 = pnand %p1105_p10, %p1101_p7 }
 0x11e   :  { %1109 = shalt.err (!%p1106_p11)  }
 0x11f   :  { %339 = dma.hbm_to_vmem [thread:$0]  %s335_s22, 16, %s337_s26, [#allocation3 + $0x4] }
 0x120   :  { %1230 = dma.done.wait [#allocation3 + $0x5], 16 }
 0x121   :  { %1231 = vsyncadd [#allocation3 + $0x5], 4294967280  ;;  %p683_p12 = scmp.ge.s32.totalorder %s682_s24, 0 }
 0x123   :  { %346 = sbr.rel (%p683_p12) target bundleno = 298 (0x12a), region = 77 }
 0x128   :  { %vm347_vm5 = vcmask 253952   ;;  %v1273_v5 = vmov 0.0  }
 0x129   :  { %348 = vst.msk [vmem:[#allocation2 + $0x5] sm:$0x1] %vm347_vm5, %v1273_v5 }
 0x12a PF:  { %s684_s4 = sld [smem:[#allocation5 + $0xd]]  ;;  %s1274_s8 = smov [#allocation2 + $0xd]  }
 0x12b   :  { %s690_s5 = sld [smem:[#allocation5 + $0x6]]  ;;  %s366_s13 = sshll.u32 %s1274_s8, 4  ;;  %s367_s13 = int_to_ptr.vmem [resolvable:$true] %s366_s13 }
 0x130   :  { %p351_p13 = scmp.gt.s32.totalorder %s684_s4, 0  ;;  %p685_p0 = scmp.lt.s32.totalorder %s684_s4, 31 }
 0x132   :  { %s1536_s4 = smov (!%p351_p13, %s684_s4), 0 }
 0x133   :  { %s1538_s4 = smov (!%p685_p0, %s1536_s4), 31 }
 0x134   :  { %s355_s21 = scalar_lea.hbm %s1491_s1, %s1538_s4 }
 0x135   :  { %s364_s9 = sshll.u32 %s355_s21, 4  ;;  %s365_s9 = int_to_ptr.hbm [resolvable:$true] %s364_s9 }
 0x136   :  { %s1122_s10 = sshra.s32 %s365_s9, 4  ;;  %s1123_s10 = int_to_ptr.hbm [resolvable:$true] %s1122_s10 }
 0x137   :  { %s1124_s11 = scalar_lea.hbm %s1123_s10, 1  ;;  %p1127_p2 = scmp.lt.s32.totalorder %s1123_s10, %s1491_s1 }
 0x138   :  { %p1125_p1 = scmp.ne.s32.totalorder %s1123_s10, %s1124_s11  ;;  %p1128_p3 = scmp.lt.s32.totalorder %s1335_s7, %s1124_s11 }
 0x13a   :  { %p1129_p4 = por %p1128_p3, %p1127_p2 }
 0x13c   :  { %p1130_p5 = pnand %p1129_p4, %p1125_p1 }
 0x13e   :  { %1133 = shalt.err (!%p1130_p5)  }
 0x13f   :  { %369 = dma.hbm_to_vmem [thread:$0]  %s365_s9, 16, %s367_s13, [#allocation3 + $0x5] }
 0x140   :  { %1232 = dma.done.wait [#allocation3 + $0x6], 16 }
 0x141   :  { %1233 = vsyncadd [#allocation3 + $0x6], 4294967280  ;;  %p691_p6 = scmp.ge.s32.totalorder %s690_s5, 0 }
 0x143   :  { %376 = sbr.rel (%p691_p6) target bundleno = 330 (0x14a), region = 85 }
 0x148   :  { %vm377_vm6 = vcmask 253952   ;;  %v1275_v6 = vmov 0.0  }
 0x149   :  { %378 = vst.msk [vmem:[#allocation2 + $0x6] sm:$0x1] %vm377_vm6, %v1275_v6 }
 0x14a PF:  { %s692_s16 = sld [smem:[#allocation5 + $0xe]]  ;;  %s1276_s12 = smov [#allocation2 + $0xe]  }
 0x14b   :  { %s698_s17 = sld [smem:[#allocation5 + $0x7]]  ;;  %s396_s19 = sshll.u32 %s1276_s12, 4  ;;  %s397_s19 = int_to_ptr.vmem [resolvable:$true] %s396_s19 }
 0x150   :  { %p381_p7 = scmp.gt.s32.totalorder %s692_s16, 0  ;;  %p693_p8 = scmp.lt.s32.totalorder %s692_s16, 31 }
 0x152   :  { %s1540_s16 = smov (!%p381_p7, %s692_s16), 0 }
 0x153   :  { %s1542_s16 = smov (!%p693_p8, %s1540_s16), 31 }
 0x154   :  { %s385_s25 = scalar_lea.hbm %s1491_s1, %s1542_s16 }
 0x155   :  { %s394_s26 = sshll.u32 %s385_s25, 4  ;;  %s395_s26 = int_to_ptr.hbm [resolvable:$true] %s394_s26 }
 0x156   :  { %s1146_s0 = sshra.s32 %s395_s26, 4  ;;  %s1147_s0 = int_to_ptr.hbm [resolvable:$true] %s1146_s0 }
 0x157   :  { %s1148_s27 = scalar_lea.hbm %s1147_s0, 1  ;;  %p1151_p10 = scmp.lt.s32.totalorder %s1147_s0, %s1491_s1 }
 0x158   :  { %p1149_p9 = scmp.ne.s32.totalorder %s1147_s0, %s1148_s27  ;;  %p1152_p11 = scmp.lt.s32.totalorder %s1335_s7, %s1148_s27 }
 0x15a   :  { %p1153_p12 = por %p1152_p11, %p1151_p10 }
 0x15c   :  { %p1154_p13 = pnand %p1153_p12, %p1149_p9 }
 0x15e   :  { %1157 = shalt.err (!%p1154_p13)  }
 0x15f   :  { %399 = dma.hbm_to_vmem [thread:$0]  %s395_s26, 16, %s397_s19, [#allocation3 + $0x6] }
 0x160   :  { %1234 = dma.done.wait [#allocation3 + $0x7], 16 }
 0x161   :  { %1235 = vsyncadd [#allocation3 + $0x7], 4294967280  ;;  %p699_p0 = scmp.ge.s32.totalorder %s698_s17, 0 }
 0x163   :  { %406 = sbr.rel (%p699_p0) target bundleno = 362 (0x16a), region = 93 }
 0x168   :  { %vm407_vm7 = vcmask 253952   ;;  %v1277_v7 = vmov 0.0  }
 0x169   :  { %408 = vst.msk [vmem:[#allocation2 + $0x7] sm:$0x1] %vm407_vm7, %v1277_v7 }
 0x16a PF:  { %s700_s18 = sld [smem:[#allocation5 + $0xf]]  ;;  %s1278_s30 = smov [#allocation2 + $0xf]  }
 0x16b   :  { %s706_s29 = sld [smem:[#allocation5 + $0x8]]  ;;  %s426_s3 = sshll.u32 %s1278_s30, 4  ;;  %s427_s3 = int_to_ptr.vmem [resolvable:$true] %s426_s3 }
 0x170   :  { %p411_p1 = scmp.gt.s32.totalorder %s700_s18, 0  ;;  %p701_p2 = scmp.lt.s32.totalorder %s700_s18, 31 }
 0x172   :  { %s1544_s18 = smov (!%p411_p1, %s700_s18), 0 }
 0x173   :  { %s1546_s18 = smov (!%p701_p2, %s1544_s18), 31 }
 0x174   :  { %s415_s8 = scalar_lea.hbm %s1491_s1, %s1546_s18 }
 0x175   :  { %s424_s13 = sshll.u32 %s415_s8, 4  ;;  %s425_s13 = int_to_ptr.hbm [resolvable:$true] %s424_s13 }
 0x176   :  { %s1170_s6 = sshra.s32 %s425_s13, 4  ;;  %s1171_s6 = int_to_ptr.hbm [resolvable:$true] %s1170_s6 }
 0x177   :  { %s1172_s20 = scalar_lea.hbm %s1171_s6, 1  ;;  %p1175_p4 = scmp.lt.s32.totalorder %s1171_s6, %s1491_s1 }
 0x178   :  { %p1173_p3 = scmp.ne.s32.totalorder %s1171_s6, %s1172_s20  ;;  %p1176_p5 = scmp.lt.s32.totalorder %s1335_s7, %s1172_s20 }
 0x17a   :  { %p1177_p6 = por %p1176_p5, %p1175_p4 }
 0x17c   :  { %p1178_p7 = pnand %p1177_p6, %p1173_p3 }
 0x17e   :  { %1181 = shalt.err (!%p1178_p7)  }
 0x17f   :  { %429 = dma.hbm_to_vmem [thread:$0]  %s425_s13, 16, %s427_s3, [#allocation3 + $0x7] }
 0x180   :  { %1236 = dma.done.wait [#allocation3], 16 }
 0x181   :  { %1237 = vsyncadd [#allocation3], 4294967280  ;;  %p707_p8 = scmp.ge.s32.totalorder %s706_s29, 0 }
 0x183   :  { %436 = sbr.rel (%p707_p8) target bundleno = 394 (0x18a), region = 101 }
 0x188   :  { %vm437_vm8 = vcmask 253952   ;;  %v1279_v8 = vmov 0.0  }
 0x189   :  { %438 = vst.msk [vmem:[#allocation2 + $0x8] sm:$0x1] %vm437_vm8, %v1279_v8 }
 0x18a PF:  { %s708_s10 = sld [smem:[#allocation5 + $0x9]] }
 0x18b   :  { %1238 = dma.done.wait [#allocation3 + $0x1], 16 }
 0x18c   :  { %1239 = vsyncadd [#allocation3 + $0x1], 4294967280 }
 0x190   :  { %p709_p9 = scmp.ge.s32.totalorder %s708_s10, 0 }
 0x192   :  { %445 = sbr.rel (%p709_p9) target bundleno = 409 (0x199), region = 105 }
 0x197   :  { %vm446_vm9 = vcmask 253952   ;;  %v1280_v9 = vmov 0.0  }
 0x198   :  { %447 = vst.msk [vmem:[#allocation2 + $0x9] sm:$0x1] %vm446_vm9, %v1280_v9 }
 0x199 PF:  { %s710_s1 = sld [smem:[#allocation5 + $0xa]] }
 0x19a   :  { %1240 = dma.done.wait [#allocation3 + $0x2], 16 }
 0x19b   :  { %1241 = vsyncadd [#allocation3 + $0x2], 4294967280 }
 0x19f   :  { %p711_p10 = scmp.ge.s32.totalorder %s710_s1, 0 }
 0x1a1   :  { %454 = sbr.rel (%p711_p10) target bundleno = 424 (0x1a8), region = 109 }
 0x1a6   :  { %vm455_vm10 = vcmask 253952   ;;  %v1281_v10 = vmov 0.0  }
 0x1a7   :  { %456 = vst.msk [vmem:[#allocation2 + $0xa] sm:$0x1] %vm455_vm10, %v1281_v10 }
 0x1a8 PF:  { %s712_s7 = sld [smem:[#allocation5 + $0xb]] }
 0x1a9   :  { %1242 = dma.done.wait [#allocation3 + $0x3], 16 }
 0x1aa   :  { %1243 = vsyncadd [#allocation3 + $0x3], 4294967280 }
 0x1ae   :  { %p713_p11 = scmp.ge.s32.totalorder %s712_s7, 0 }
 0x1b0   :  { %463 = sbr.rel (%p713_p11) target bundleno = 439 (0x1b7), region = 113 }
 0x1b5   :  { %vm464_vm11 = vcmask 253952   ;;  %v1282_v11 = vmov 0.0  }
 0x1b6   :  { %465 = vst.msk [vmem:[#allocation2 + $0xb] sm:$0x1] %vm464_vm11, %v1282_v11 }
 0x1b7 PF:  { %s714_s11 = sld [smem:[#allocation5 + $0xc]] }
 0x1b8   :  { %1244 = dma.done.wait [#allocation3 + $0x4], 16 }
 0x1b9   :  { %1245 = vsyncadd [#allocation3 + $0x4], 4294967280 }
 0x1bd   :  { %p715_p12 = scmp.ge.s32.totalorder %s714_s11, 0 }
 0x1bf   :  { %472 = sbr.rel (%p715_p12) target bundleno = 454 (0x1c6), region = 117 }
 0x1c4   :  { %vm473_vm12 = vcmask 253952   ;;  %v1283_v12 = vmov 0.0  }
 0x1c5   :  { %474 = vst.msk [vmem:[#allocation2 + $0xc] sm:$0x1] %vm473_vm12, %v1283_v12 }
 0x1c6 PF:  { %s716_s14 = sld [smem:[#allocation5 + $0xd]] }
 0x1c7   :  { %1246 = dma.done.wait [#allocation3 + $0x5], 16 }
 0x1c8   :  { %1247 = vsyncadd [#allocation3 + $0x5], 4294967280 }
 0x1cc   :  { %p717_p13 = scmp.ge.s32.totalorder %s716_s14, 0 }
 0x1ce   :  { %481 = sbr.rel (%p717_p13) target bundleno = 469 (0x1d5), region = 121 }
 0x1d3   :  { %vm482_vm13 = vcmask 253952   ;;  %v1284_v13 = vmov 0.0  }
 0x1d4   :  { %483 = vst.msk [vmem:[#allocation2 + $0xd] sm:$0x1] %vm482_vm13, %v1284_v13 }
 0x1d5 PF:  { %s718_s15 = sld [smem:[#allocation5 + $0xe]] }
 0x1d6   :  { %1248 = dma.done.wait [#allocation3 + $0x6], 16 }
 0x1d7   :  { %1249 = vsyncadd [#allocation3 + $0x6], 4294967280 }
 0x1db   :  { %p719_p0 = scmp.ge.s32.totalorder %s718_s15, 0 }
 0x1dd   :  { %490 = sbr.rel (%p719_p0) target bundleno = 484 (0x1e4), region = 125 }
 0x1e2   :  { %vm491_vm14 = vcmask 253952   ;;  %v1285_v14 = vmov 0.0  }
 0x1e3   :  { %492 = vst.msk [vmem:[#allocation2 + $0xe] sm:$0x1] %vm491_vm14, %v1285_v14 }
 0x1e4 PF:  { %s720_s16 = sld [smem:[#allocation5 + $0xf]] }
 0x1e5   :  { %1250 = dma.done.wait [#allocation3 + $0x7], 16 }
 0x1e6   :  { %1251 = vsyncadd [#allocation3 + $0x7], 4294967280 }
 0x1ea   :  { %p721_p1 = scmp.ge.s32.totalorder %s720_s16, 0 }
 0x1ec   :  { %499 = sbr.rel (%p721_p1) target bundleno = 499 (0x1f3), region = 129 }
 0x1f1   :  { %vm500_vm15 = vcmask 253952   ;;  %v1286_v15 = vmov 0.0  }
 0x1f2   :  { %501 = vst.msk [vmem:[#allocation2 + $0xf] sm:$0x1] %vm500_vm15, %v1286_v15 }
 0x1f3 PF:  { %v502_v16 = vld [vmem:[#allocation2] sm:$0xff]  ;;  %vm504_vm0 = vcmask 261120   ;;  %s513_s19 = sshll.u32 %s1492_s2, 4  ;;  %s1287_s23 = smov [#allocation6]   ;;  %s514_s19 = int_to_ptr.hbm [resolvable:$true] %s513_s19 }
 0x1f4   :  { %505 = vst.msk [vmem:[#allocation6] sm:$0xff] %vm504_vm0, %v502_v16  ;;  %s511_s24 = sshll.u32 %s1287_s23, 4  ;;  %s1288_s25 = smov 128   ;;  %s512_s24 = int_to_ptr.vmem [resolvable:$true] %s511_s24 }
 0x1f5   :  { %s1289_s26 = smov 8  }
 0x1f9   :  { %v503_v17 = vld [vmem:[#allocation2 + $0x8] sm:$0xff] }
 0x1fa   :  { %506 = vst.msk [vmem:[#allocation6 + $0x8] sm:$0xff] %vm504_vm0, %v503_v17 }
 0x1fb   :  { %519 = dma.vmem_to_hbm [thread:$0]  %s512_s24, 256, %s514_s19, [#allocation7], %s1288_s25, %s1288_s25, %s1289_s26  }
 0x1fc   :  { %1252 = dma.done.wait [#allocation7], 256  }
 0x1fd   :  { %1253 = vsyncadd [#allocation7], 4294967040 }
 0x1fe   :  { %524 = vsyncpa [#allocation7], 1 }
 0x1ff   :  { %525 = vsyncmov [#allocation3] }
 0x202   :  { %s526_s0 = vpop.sfrf %525 }
 0x203   :  { %p722_p2 = scmp.ne.s32.totalorder %s526_s0, 0 }
 0x205   :  { %530 = shalt.err (%p722_p2)  }
 0x206   :  { %532 = vsyncmov [#allocation3 + $0x1] }
 0x209   :  { %s533_s27 = vpop.sfrf %532 }
 0x20a   :  { %p723_p3 = scmp.ne.s32.totalorder %s533_s27, 0 }
 0x20c   :  { %537 = shalt.err (%p723_p3)  }
 0x20d   :  { %539 = vsyncmov [#allocation3 + $0x2] }
 0x210   :  { %s540_s2 = vpop.sfrf %539 }
 0x211   :  { %p724_p4 = scmp.ne.s32.totalorder %s540_s2, 0 }
 0x213   :  { %544 = shalt.err (%p724_p4)  }
 0x214   :  { %546 = vsyncmov [#allocation3 + $0x3] }
 0x217   :  { %s547_s28 = vpop.sfrf %546 }
 0x218   :  { %p725_p5 = scmp.ne.s32.totalorder %s547_s28, 0 }
 0x21a   :  { %551 = shalt.err (%p725_p5)  }
 0x21b   :  { %553 = vsyncmov [#allocation3 + $0x4] }
 0x21e   :  { %s554_s22 = vpop.sfrf %553 }
 0x21f   :  { %p726_p6 = scmp.ne.s32.totalorder %s554_s22, 0 }
 0x221   :  { %558 = shalt.err (%p726_p6)  }
 0x222   :  { %560 = vsyncmov [#allocation3 + $0x5] }
 0x225   :  { %s561_s18 = vpop.sfrf %560 }
 0x226   :  { %p727_p7 = scmp.ne.s32.totalorder %s561_s18, 0 }
 0x228   :  { %565 = shalt.err (%p727_p7)  }
 0x229   :  { %567 = vsyncmov [#allocation3 + $0x6] }
 0x22c   :  { %s568_s29 = vpop.sfrf %567 }
 0x22d   :  { %p728_p8 = scmp.ne.s32.totalorder %s568_s29, 0 }
 0x22f   :  { %572 = shalt.err (%p728_p8)  }
 0x230   :  { %574 = vsyncmov [#allocation3 + $0x7] }
 0x233   :  { %s575_s30 = vpop.sfrf %574 }
 0x234   :  { %p729_p9 = scmp.ne.s32.totalorder %s575_s30, 0 }
 0x236   :  { %579 = shalt.err (%p729_p9)  }

</bundles_post_ra>
